<compile_context>
chip_gen: v5e
topology: v5e:2x2
jax: 0.10.0
libtpu: 0.0.40
codegen_flags: <defaults>
</compile_context>

<pallas_src>
import functools

import jax
import jax.numpy as jnp
from jax import lax
from jax.experimental import pallas as pl
from jax.experimental.pallas import tpu as pltpu

LN_EPS = 1e-5


def gene_encoder_kernel(ids_ref, emb_ref, gamma_ref, beta_ref, out_ref, *,
                        vchunk, num_chunks, true_d):
    # ids_ref:   (TR, 1)        int32 token ids for this block
    # emb_ref:   (V_pad, D_pad) embedding table (VMEM-resident, single buffer)
    # gamma_ref: (1, D_pad)     LayerNorm weight (zero-padded past true_d)
    # beta_ref:  (1, D_pad)     LayerNorm bias   (zero-padded past true_d)
    # out_ref:   (TR, D_pad)    output block
    ids = ids_ref[...]                                        # (TR, 1)
    tr = ids.shape[0]
    d_pad = out_ref.shape[1]

    def chunk_contrib(start, acc):
        # Exact one-hot gather on the MXU for one vocab chunk.
        chunk = emb_ref[pl.ds(start, vchunk), :]              # (tv, D_pad)
        iota = lax.broadcasted_iota(jnp.int32, (tr, vchunk), 1) + start
        onehot = (ids == iota).astype(emb_ref.dtype)          # (TR, tv), 0/1
        return acc + jnp.dot(onehot, chunk,
                             preferred_element_type=jnp.float32)

    acc0 = jnp.zeros((tr, d_pad), jnp.float32)
    if num_chunks == 1:
        rows = chunk_contrib(0, acc0)                         # (TR, D_pad) f32
    else:
        rows = lax.fori_loop(
            0, num_chunks,
            lambda c, acc: chunk_contrib(
                pl.multiple_of(c * vchunk, vchunk), acc),
            acc0)

    # LayerNorm over the true D columns (padded columns are exactly zero).
    inv_d = 1.0 / true_d
    mean = jnp.sum(rows, axis=-1, keepdims=True) * inv_d      # (TR, 1)
    centered = rows - mean
    if true_d != d_pad:
        col = lax.broadcasted_iota(jnp.int32, (1, d_pad), 1)
        centered_true = jnp.where(col < true_d, centered, 0.0)
    else:
        centered_true = centered
    var = jnp.sum(centered_true * centered_true, axis=-1, keepdims=True) * inv_d
    scale = lax.rsqrt(var + LN_EPS) * gamma_ref[...]          # (TR,1)*(1,D_pad)
    # Padded columns: gamma=beta=0 there -> output 0 (sliced off in wrapper).
    out_ref[...] = (centered * scale + beta_ref[...]).astype(out_ref.dtype)


def gene_encoder_forward(ids, emb_table, gamma, beta, *,
                         block_rows=None, vocab_chunk=512, gather_dtype=None):
    """ids: (B, S) int; emb_table: (V, D); gamma/beta: (D,). Returns (B, S, D) f32."""
    B, S = ids.shape
    V, D = emb_table.shape
    N = B * S

    gdtype = jnp.dtype(gather_dtype) if gather_dtype is not None else emb_table.dtype

    kind = jax.devices()[0].device_kind.lower()
    is_v5e = ("v5e" in kind) or ("v5 lite" in kind) or ("v5lite" in kind)
    is_v7 = "v7" in kind

    # v6e/v7x MXUs are 256-wide -> 256-row tiles; v5e's MXU is 128-wide.
    tr = block_rows if block_rows is not None else (128 if is_v5e else 256)

    # Lane-dense feature dim and lane-aligned vocab chunking.
    d_pad = pl.cdiv(D, 128) * 128
    tv = min(vocab_chunk, pl.cdiv(V, 128) * 128)
    v_pad = pl.cdiv(V, tv) * tv
    num_chunks = v_pad // tv

    n_pad = pl.cdiv(N, tr) * tr

    # NOTE: unlike torch.nn.Embedding (which raises), out-of-range ids are
    # clamped to [0, V-1]; padded tail rows use id 0 and are sliced off.
    ids_flat = jnp.clip(ids.reshape(N).astype(jnp.int32), 0, V - 1)
    ids_2d = jnp.zeros((n_pad, 1), jnp.int32).at[:N, 0].set(ids_flat)

    # One-time cast / zero-pad of the table and LN params (no per-step casts
    # inside the kernel). Padded vocab rows / feature columns are zero.
    emb_p = jnp.zeros((v_pad, d_pad), gdtype).at[:V, :D].set(
        emb_table.astype(gdtype))
    gamma_p = jnp.zeros((1, d_pad), jnp.float32).at[0, :D].set(
        gamma.astype(jnp.float32))
    beta_p = jnp.zeros((1, d_pad), jnp.float32).at[0, :D].set(
        beta.astype(jnp.float32))

    table_vmem = v_pad * d_pad * jnp.dtype(gdtype).itemsize
    # VMEM-resident-table budget; v7x has only 64 MiB/TC and with the
    # "parallel" grid axis each TensorCore holds its own single-buffered copy.
    table_cap = (16 << 20) if is_v7 else (48 << 20)
    # TODO(synk): tables above table_cap need the HBM-resident, scalar-prefetch
    # (or manually double-buffered DMA) row-gather path instead of this
    # VMEM-resident one-hot-matmul gather.
    assert table_vmem <= table_cap, "embedding table too large for VMEM-resident path"

    # VMEM budget: single-buffered table/params + double-buffered ids/out
    # blocks + in-kernel one-hot / accumulator intermediates.
    vmem_need = (table_vmem
                 + 2 * tr * 128 * 4          # (tr,1) int32 ids, lane-padded
                 + 2 * tr * d_pad * 4        # output blocks
                 + 2 * 8 * d_pad * 4         # gamma/beta, sublane-padded
                 + tr * d_pad * 4            # f32 row accumulator
                 + tr * tv * 4               # one-hot chunk (conservative)
                 + tv * d_pad * 4)           # table chunk working set
    vmem_cap = (48 << 20) if is_v7 else (100 << 20)
    vmem_limit = min(max(int(1.25 * vmem_need) + (2 << 20), 16 << 20), vmem_cap)

    grid = (n_pad // tr,)
    flops = 2 * n_pad * v_pad * d_pad + 10 * n_pad * d_pad
    bytes_accessed = table_vmem + n_pad * 4 + n_pad * d_pad * 4 + 2 * d_pad * 4

    kernel = functools.partial(gene_encoder_kernel, vchunk=tv,
                               num_chunks=num_chunks, true_d=D)

    out = pl.pallas_call(
        kernel,
        out_shape=jax.ShapeDtypeStruct((n_pad, d_pad), jnp.float32),
        grid_spec=pltpu.PrefetchScalarGridSpec(
            num_scalar_prefetch=0,
            grid=grid,
            in_specs=[
                pl.BlockSpec((tr, 1), lambda i: (i, 0)),        # token ids
                pl.BlockSpec((v_pad, d_pad), lambda i: (0, 0),  # full table
                             pipeline_mode=pl.Buffered(1)),
                pl.BlockSpec((1, d_pad), lambda i: (0, 0),      # gamma
                             pipeline_mode=pl.Buffered(1)),
                pl.BlockSpec((1, d_pad), lambda i: (0, 0),      # beta
                             pipeline_mode=pl.Buffered(1)),
            ],
            out_specs=pl.BlockSpec((tr, d_pad), lambda i: (i, 0)),
        ),
        compiler_params=pltpu.CompilerParams(
            dimension_semantics=("parallel",),
            vmem_limit_bytes=vmem_limit,
        ),
        cost_estimate=pl.CostEstimate(
            flops=flops, transcendentals=n_pad, bytes_accessed=bytes_accessed),
    )(ids_2d, emb_p, gamma_p, beta_p)

    return out[:N, :D].reshape(B, S, D)


def gene_encoder_reference(ids, emb_table, gamma, beta):
    x = emb_table[ids]                                        # (B, S, D)
    mean = jnp.mean(x, axis=-1, keepdims=True)
    var = jnp.mean((x - mean) ** 2, axis=-1, keepdims=True)
    return (x - mean) / jnp.sqrt(var + LN_EPS) * gamma + beta


if __name__ == "__main__":
    # GeneEncoder(num_embeddings=64, embedding_dim=32, padding_idx=0)
    num_embeddings, embedding_dim, padding_idx = 64, 32, 0
    batch, seq = 2, 8

    key = jax.random.PRNGKey(0)
    k_emb, k_ids = jax.random.split(key)

    # nn.Embedding default init: N(0, 1); padding_idx row zeroed.
    emb_table = jax.random.normal(k_emb, (num_embeddings, embedding_dim),
                                  dtype=jnp.float32)
    emb_table = emb_table.at[padding_idx].set(0.0)
    # nn.LayerNorm default affine: weight=1, bias=0.
    gamma = jnp.ones((embedding_dim,), dtype=jnp.float32)
    beta = jnp.zeros((embedding_dim,), dtype=jnp.float32)

    ids = jax.random.randint(k_ids, (batch, seq), 0, num_embeddings,
                             dtype=jnp.int32)

    # Exact f32 path (matches the PyTorch module bit-for-bit up to LN rounding).
    out = gene_encoder_forward(ids, emb_table, gamma, beta)
    out = jax.block_until_ready(out)
    ref = gene_encoder_reference(ids, emb_table, gamma, beta)
    assert out.shape == (batch, seq, embedding_dim)
    assert jnp.allclose(out, ref, atol=1e-5, rtol=1e-5)

    # bf16-table fast path (gather stays exact; validate against a bf16 table).
    out_bf16 = gene_encoder_forward(ids, emb_table, gamma, beta,
                                    gather_dtype=jnp.bfloat16)
    out_bf16 = jax.block_until_ready(out_bf16)
    ref_bf16 = gene_encoder_reference(
        ids, emb_table.astype(jnp.bfloat16).astype(jnp.float32), gamma, beta)
    assert jnp.allclose(out_bf16, ref_bf16, atol=1e-4, rtol=1e-4)

    print("KERNEL_OK")
</pallas_src>

<mosaic_0001>
module attributes {stable_mosaic.version = 11 : i64} {
  func.func @gene_encoder_kernel(%arg0: i32, %arg1: memref<256x1xi32, #tpu.memory_space<vmem>>, %arg2: memref<128x128xf32, #tpu.memory_space<vmem>>, %arg3: memref<1x128xf32, #tpu.memory_space<vmem>>, %arg4: memref<1x128xf32, #tpu.memory_space<vmem>>, %arg5: memref<256x128xf32, #tpu.memory_space<vmem>>) attributes {dimension_semantics = [#tpu.dimension_semantics<parallel>], iteration_bounds = array<i64: 1>, scalar_prefetch = 0 : i64, scratch_operands = 0 : i64, tpu.core_type = #tpu.core_type<tc>, window_params = [{transform_indices = @transform_0, window_bounds = array<i64: 256, 1>}, {pipeline_mode = #tpu.pipeline_mode<synchronous>, transform_indices = @transform_1, window_bounds = array<i64: 128, 128>}, {pipeline_mode = #tpu.pipeline_mode<synchronous>, transform_indices = @transform_2, window_bounds = array<i64: 1, 128>}, {pipeline_mode = #tpu.pipeline_mode<synchronous>, transform_indices = @transform_3, window_bounds = array<i64: 1, 128>}, {transform_indices = @transform_4, window_bounds = array<i64: 256, 128>}]} {
    %c0 = arith.constant 0 : index
    %c0_0 = arith.constant 0 : index
    %0 = vector.load %arg1[%c0, %c0_0] : memref<256x1xi32, #tpu.memory_space<vmem>>, vector<256x1xi32>
    %cst = arith.constant 0.000000e+00 : f32
    %1 = vector.broadcast %cst : f32 to vector<256x128xf32>
    %c0_1 = arith.constant 0 : index
    %c0_2 = arith.constant 0 : index
    %2 = vector.load %arg2[%c0_1, %c0_2] : memref<128x128xf32, #tpu.memory_space<vmem>>, vector<128x128xf32>
    %3 = tpu.iota {dimensions = array<i32: 1>} : vector<256x128xi32>
    %c0_i32 = arith.constant 0 : i32
    %4 = vector.broadcast %c0_i32 : i32 to vector<256x128xi32>
    %5 = arith.addi %3, %4 : vector<256x128xi32>
    %6 = vector.broadcast %0 : vector<256x1xi32> to vector<256x128xi32>
    %7 = arith.cmpi eq, %6, %5 : vector<256x128xi32>
    %8 = arith.extui %7 : vector<256x128xi1> to vector<256x128xi32>
    %9 = arith.sitofp %8 : vector<256x128xi32> to vector<256x128xf32>
    %cst_3 = arith.constant dense<0.000000e+00> : vector<256x128xf32>
    %10 = tpu.matmul %9, %2, %cst_3 {dimension_numbers = #tpu.dot_dimension_numbers<[1], [0], [0], [1], [0, 0, 1, 1], [], []>} : vector<256x128xf32>, vector<128x128xf32>, vector<256x128xf32> -> vector<256x128xf32>
    %11 = arith.addf %1, %10 : vector<256x128xf32>
    %cst_4 = arith.constant dense<0.000000e+00> : vector<256xf32>
    %12 = vector.multi_reduction <add>, %11, %cst_4 [1] : vector<256x128xf32> to vector<256xf32>
    %13 = vector.shape_cast %12 : vector<256xf32> to vector<256x1xf32>
    %cst_5 = arith.constant 3.125000e-02 : f32
    %14 = vector.broadcast %cst_5 : f32 to vector<256x1xf32>
    %15 = arith.mulf %13, %14 : vector<256x1xf32>
    %16 = vector.broadcast %15 : vector<256x1xf32> to vector<256x128xf32>
    %17 = arith.subf %11, %16 : vector<256x128xf32>
    %18 = tpu.iota {dimensions = array<i32: 1>} : vector<1x128xi32>
    %c32_i32 = arith.constant 32 : i32
    %19 = vector.broadcast %c32_i32 : i32 to vector<1x128xi32>
    %20 = arith.cmpi slt, %18, %19 : vector<1x128xi32>
    %cst_6 = arith.constant 0.000000e+00 : f32
    %21 = vector.shape_cast %20 : vector<1x128xi1> to vector<1x128xi1>
    %22 = vector.broadcast %21 : vector<1x128xi1> to vector<256x128xi1>
    %23 = vector.broadcast %cst_6 : f32 to vector<256x128xf32>
    %24 = arith.select %22, %17, %23 : vector<256x128xi1>, vector<256x128xf32>
    %25 = arith.mulf %24, %24 : vector<256x128xf32>
    %cst_7 = arith.constant dense<0.000000e+00> : vector<256xf32>
    %26 = vector.multi_reduction <add>, %25, %cst_7 [1] : vector<256x128xf32> to vector<256xf32>
    %27 = vector.shape_cast %26 : vector<256xf32> to vector<256x1xf32>
    %cst_8 = arith.constant 3.125000e-02 : f32
    %28 = vector.broadcast %cst_8 : f32 to vector<256x1xf32>
    %29 = arith.mulf %27, %28 : vector<256x1xf32>
    %cst_9 = arith.constant 9.99999974E-6 : f32
    %30 = vector.broadcast %cst_9 : f32 to vector<256x1xf32>
    %31 = arith.addf %29, %30 : vector<256x1xf32>
    %32 = math.rsqrt %31 : vector<256x1xf32>
    %c0_10 = arith.constant 0 : index
    %c0_11 = arith.constant 0 : index
    %33 = vector.load %arg3[%c0_10, %c0_11] : memref<1x128xf32, #tpu.memory_space<vmem>>, vector<1x128xf32>
    %34 = vector.broadcast %32 : vector<256x1xf32> to vector<256x128xf32>
    %35 = vector.broadcast %33 : vector<1x128xf32> to vector<256x128xf32>
    %36 = arith.mulf %34, %35 : vector<256x128xf32>
    %37 = arith.mulf %17, %36 : vector<256x128xf32>
    %c0_12 = arith.constant 0 : index
    %c0_13 = arith.constant 0 : index
    %38 = vector.load %arg4[%c0_12, %c0_13] : memref<1x128xf32, #tpu.memory_space<vmem>>, vector<1x128xf32>
    %39 = vector.broadcast %38 : vector<1x128xf32> to vector<256x128xf32>
    %40 = arith.addf %37, %39 : vector<256x128xf32>
    %c0_14 = arith.constant 0 : index
    %c0_15 = arith.constant 0 : index
    %41 = vector.load %arg5[%c0_14, %c0_15] : memref<256x128xf32, #tpu.memory_space<vmem>>, vector<256x128xf32>
    tpu.vector_store %arg5[%c0_14, %c0_15], %40 {strides = array<i32>} : memref<256x128xf32, #tpu.memory_space<vmem>>, vector<256x128xf32>,
    return
  }
  func.func @transform_0(%arg0: i32) -> (i32, i32) {
    %c0_i32 = arith.constant 0 : i32
    %c0_i32_0 = arith.constant 0 : i32
    return %arg0, %c0_i32 : i32, i32
  }
  func.func @transform_1(%arg0: i32) -> (i32, i32) {
    %c0_i32 = arith.constant 0 : i32
    %c0_i32_0 = arith.constant 0 : i32
    %c0_i32_1 = arith.constant 0 : i32
    return %c0_i32, %c0_i32_0 : i32, i32
  }
  func.func @transform_2(%arg0: i32) -> (i32, i32) {
    %c0_i32 = arith.constant 0 : i32
    %c0_i32_0 = arith.constant 0 : i32
    %c0_i32_1 = arith.constant 0 : i32
    return %c0_i32, %c0_i32_0 : i32, i32
  }
  func.func @transform_3(%arg0: i32) -> (i32, i32) {
    %c0_i32 = arith.constant 0 : i32
    %c0_i32_0 = arith.constant 0 : i32
    %c0_i32_1 = arith.constant 0 : i32
    return %c0_i32, %c0_i32_0 : i32, i32
  }
  func.func @transform_4(%arg0: i32) -> (i32, i32) {
    %c0_i32 = arith.constant 0 : i32
    %c0_i32_0 = arith.constant 0 : i32
    return %arg0, %c0_i32 : i32, i32
  }
}

</mosaic_0001>

<bundles_post_ra>
// kernel: tpu_custom_call.1
= control target key start
LH: loop header
LB: loop body
LE: loop exit
PB: predicated region body
PF: predicated region fallthrough
CT: control target
= control target key end

     0   :  { %v1384_v3 = vmov 0   ;;  %s2322_s0 = inlined_call_operand.vmem [shape: s32[256,1], index: 0, kind: input, shape index: {}]   ;;  %s2323_s1 = inlined_call_operand.vmem [shape: f32[128,128], index: 1, kind: input, shape index: {}]   ;;  %s2324_s2 = inlined_call_operand.vmem [shape: f32[1,128], index: 2, kind: input, shape index: {}]   ;;  %s2325_s3 = inlined_call_operand.vmem [shape: f32[1,128], index: 3, kind: input, shape index: {}]   ;;  %s2326_s4 = inlined_call_operand.hbm [shape: f32[256,128], index: 4, kind: output, shape index: {}]  }
   0x1   :  { %v22_v0 = vld [vmem:[%s2322_s0 + $0x20] sm:$0xff]  ;;  %v20_v1 = vld [vmem:[%s2322_s0 + $0x10] sm:$0xff]  ;;  %1289 = vset.pattern.permute.xlu2 %v1384_v3  ;;  %1288 = vset.pattern.permute.xlu1 %v1384_v3 }
   0x2   :  { %v18_v2 = vld [vmem:[%s2322_s0] sm:$0xff]  ;;  %1287 = vset.pattern.permute.xlu0 %v1384_v3  ;;  %81 = vperm.xlu2 %1289, %v22_v0  }
   0x3   :  { %75 = vperm.xlu1 %1288, %v20_v1   ;;  %69 = vperm.xlu0 %1287, %v18_v2  }
   0x4   :  { %9 = vsyncpa [#allocation3], 0  ;;  %v23_v4 = vld [vmem:[%s2322_s0 + $0x28] sm:$0xff]  ;;  %v21_v5 = vld [vmem:[%s2322_s0 + $0x18] sm:$0xff]  ;;  %v66_v51 = vlaneseq  ;;  %v1385_v54 = vmov 1.0   ;;  %s1158_s15 = sshll.u32 %s2326_s4, 4  ;;  %s1159_s15 = int_to_ptr.hbm [resolvable:$true] %s1158_s15 }
   0x5   :  { %v19_v6 = vld [vmem:[%s2322_s0 + $0x8] sm:$0xff]  ;;  %v26_v7 = vld [vmem:[%s2322_s0 + $0x40] sm:$0xff]  ;;  %v25_v8 = vld [vmem:[%s2322_s0 + $0x38] sm:$0xff]  ;;  %s1387_s16 = smov 128   ;;  %s1388_s17 = smov 8  }
   0x6   :  { %v24_v9 = vld [vmem:[%s2322_s0 + $0x30] sm:$0xff]  ;;  %v35_v10 = vld [vmem:[%s2322_s0 + $0x88] sm:$0xff]  ;;  %v42_v11 = vld [vmem:[%s2322_s0 + $0xc0] sm:$0xff]  ;;  %v1558_v52 = vand.u32 127, %v66_v51 }
   0x7   :  { %v34_v12 = vld [vmem:[%s2322_s0 + $0x80] sm:$0xff]  ;;  %v36_v13 = vld [vmem:[%s2322_s0 + $0x90] sm:$0xff]  ;;  %v27_v14 = vld [vmem:[%s2322_s0 + $0x48] sm:$0xff] }
   0x8   :  { %v43_v15 = vld [vmem:[%s2322_s0 + $0xc8] sm:$0xff]  ;;  %v37_v16 = vld [vmem:[%s2322_s0 + $0x98] sm:$0xff]  ;;  %v28_v17 = vld [vmem:[%s2322_s0 + $0x50] sm:$0xff] }
   0x9   :  { %v44_v18 = vld [vmem:[%s2322_s0 + $0xd0] sm:$0xff]  ;;  %v65_v19 = vld [vmem:[%s2323_s1 + $0x78] sm:$0xff]  ;;  %v38_v21 = vld [vmem:[%s2322_s0 + $0xa0] sm:$0xff] }
   0xa   :  { %84 = vperm.xlu2 %1289, %v23_v4   ;;  %v64_v20 = vld [vmem:[%s2323_s1 + $0x70] sm:$0xff]  ;;  %1234 = vmatpush.msra.mxu1 %v65_v19  ;;  %v29_v22 = vld [vmem:[%s2322_s0 + $0x58] sm:$0xff]  ;;  %v63_v24 = vld [vmem:[%s2323_s1 + $0x68] sm:$0xff] }
   0xb   :  { %78 = vperm.xlu1 %1288, %v21_v5   ;;  %72 = vperm.xlu0 %1287, %v19_v6   ;;  %v45_v23 = vld [vmem:[%s2322_s0 + $0xd8] sm:$0xff]  ;;  %v62_v25 = vld [vmem:[%s2323_s1 + $0x60] sm:$0xff]  ;;  %v39_v27 = vld [vmem:[%s2322_s0 + $0xa8] sm:$0xff] }
   0xc   :  { %260 = vmatpush.msra.mxu0 %v65_v19  ;;  %1235 = vmatpush.msra.mxu2 %v65_v19  ;;  %v61_v26 = vld [vmem:[%s2323_s1 + $0x58] sm:$0xff]  ;;  %v60_v28 = vld [vmem:[%s2323_s1 + $0x50] sm:$0xff]  ;;  %v30_v29 = vld [vmem:[%s2322_s0 + $0x60] sm:$0xff] }
   0xd   :  { %1236 = vmatpush.msra.mxu3 %v65_v19  ;;  %1237 = vmatpush.msra.mxu1 %v64_v20  ;;  %v46_v30 = vld [vmem:[%s2322_s0 + $0xe0] sm:$0xff]  ;;  %v59_v31 = vld [vmem:[%s2323_s1 + $0x48] sm:$0xff]  ;;  %v57_v33 = vld [vmem:[%s2323_s1 + $0x38] sm:$0xff] }
   0xe   :  { %261 = vmatpush.msra.mxu0 %v64_v20  ;;  %1238 = vmatpush.msra.mxu2 %v64_v20  ;;  %v58_v32 = vld [vmem:[%s2323_s1 + $0x40] sm:$0xff]  ;;  %v40_v34 = vld [vmem:[%s2322_s0 + $0xb0] sm:$0xff]  ;;  %v31_v36 = vld [vmem:[%s2322_s0 + $0x68] sm:$0xff] }
   0xf   :  { %1239 = vmatpush.msra.mxu3 %v64_v20  ;;  %1240 = vmatpush.msra.mxu1 %v63_v24  ;;  %v56_v35 = vld [vmem:[%s2323_s1 + $0x30] sm:$0xff]  ;;  %v47_v37 = vld [vmem:[%s2322_s0 + $0xe8] sm:$0xff]  ;;  %v54_v39 = vld [vmem:[%s2323_s1 + $0x20] sm:$0xff] }
  0x10   :  { %262 = vmatpush.msra.mxu0 %v63_v24  ;;  %1241 = vmatpush.msra.mxu2 %v63_v24  ;;  %v55_v38 = vld [vmem:[%s2323_s1 + $0x28] sm:$0xff]  ;;  %v53_v40 = vld [vmem:[%s2323_s1 + $0x18] sm:$0xff]  ;;  %v52_v42 = vld [vmem:[%s2323_s1 + $0x10] sm:$0xff] }
  0x11   :  { %1242 = vmatpush.msra.mxu3 %v63_v24  ;;  %1243 = vmatpush.msra.mxu1 %v62_v25  ;;  %v41_v41 = vld [vmem:[%s2322_s0 + $0xb8] sm:$0xff]  ;;  %v32_v43 = vld [vmem:[%s2322_s0 + $0x70] sm:$0xff]  ;;  %v51_v45 = vld [vmem:[%s2323_s1 + $0x8] sm:$0xff] }
  0x12   :  { %93 = vperm.xlu2 %1289, %v26_v7   ;;  %263 = vmatpush.msra.mxu0 %v62_v25  ;;  %v48_v44 = vld [vmem:[%s2322_s0 + $0xf0] sm:$0xff]  ;;  %v50_v46 = vld [vmem:[%s2323_s1] sm:$0xff]  ;;  %v33_v47 = vld [vmem:[%s2322_s0 + $0x78] sm:$0xff] }
  0x13   :  { %90 = vperm.xlu1 %1288, %v25_v8   ;;  %87 = vperm.xlu0 %1287, %v24_v9   ;;  %v49_v48 = vld [vmem:[%s2322_s0 + $0xf8] sm:$0xff] }
  0x14   :  { %1244 = vmatpush.msra.mxu2 %v62_v25  ;;  %1245 = vmatpush.msra.mxu3 %v62_v25 }
  0x15   :  { %1246 = vmatpush.msra.mxu1 %v61_v26  ;;  %264 = vmatpush.msra.mxu0 %v61_v26 }
  0x16   :  { %1247 = vmatpush.msra.mxu2 %v61_v26  ;;  %1248 = vmatpush.msra.mxu3 %v61_v26 }
  0x17   :  { %1249 = vmatpush.msra.mxu1 %v60_v28  ;;  %265 = vmatpush.msra.mxu0 %v60_v28 }
  0x18   :  { %1250 = vmatpush.msra.mxu2 %v60_v28  ;;  %1251 = vmatpush.msra.mxu3 %v60_v28 }
  0x19   :  { %1252 = vmatpush.msra.mxu1 %v59_v31  ;;  %266 = vmatpush.msra.mxu0 %v59_v31 }
  0x1a   :  { %120 = vperm.xlu2 %1289, %v35_v10   ;;  %1253 = vmatpush.msra.mxu2 %v59_v31 }
  0x1b   :  { %141 = vperm.xlu1 %1288, %v42_v11   ;;  %117 = vperm.xlu0 %1287, %v34_v12  }
  0x1c   :  { %1255 = vmatpush.msra.mxu1 %v58_v32  ;;  %1254 = vmatpush.msra.mxu3 %v59_v31 }
  0x1d   :  { %267 = vmatpush.msra.mxu0 %v58_v32  ;;  %1256 = vmatpush.msra.mxu2 %v58_v32 }
  0x1e   :  { %1258 = vmatpush.msra.mxu1 %v57_v33  ;;  %1257 = vmatpush.msra.mxu3 %v58_v32 }
  0x1f   :  { %268 = vmatpush.msra.mxu0 %v57_v33  ;;  %1259 = vmatpush.msra.mxu2 %v57_v33 }
  0x20   :  { %1261 = vmatpush.msra.mxu1 %v56_v35  ;;  %1260 = vmatpush.msra.mxu3 %v57_v33 }
  0x21   :  { %269 = vmatpush.msra.mxu0 %v56_v35  ;;  %1262 = vmatpush.msra.mxu2 %v56_v35 }
  0x22   :  { %123 = vperm.xlu2 %1289, %v36_v13   ;;  %1264 = vmatpush.msra.mxu1 %v55_v38 }
  0x23   :  { %96 = vperm.xlu1 %1288, %v27_v14   ;;  %144 = vperm.xlu0 %1287, %v43_v15  }
  0x24   :  { %1267 = vmatpush.msra.mxu1 %v54_v39  ;;  %1263 = vmatpush.msra.mxu3 %v56_v35 }
  0x25   :  { %270 = vmatpush.msra.mxu0 %v55_v38  ;;  %1265 = vmatpush.msra.mxu2 %v55_v38 }
  0x26   :  { %1270 = vmatpush.msra.mxu1 %v53_v40  ;;  %1266 = vmatpush.msra.mxu3 %v55_v38 }
  0x27   :  { %271 = vmatpush.msra.mxu0 %v54_v39  ;;  %1268 = vmatpush.msra.mxu2 %v54_v39 }
  0x28   :  { %1273 = vmatpush.msra.mxu1 %v52_v42  ;;  %1269 = vmatpush.msra.mxu3 %v54_v39 }
  0x29   :  { %272 = vmatpush.msra.mxu0 %v53_v40  ;;  %1271 = vmatpush.msra.mxu2 %v53_v40 }
  0x2a   :  { %126 = vperm.xlu2 %1289, %v37_v16   ;;  %1276 = vmatpush.msra.mxu1 %v51_v45 }
  0x2b   :  { %99 = vperm.xlu1 %1288, %v28_v17   ;;  %147 = vperm.xlu0 %1287, %v44_v18  }
  0x2c   :  { %1279 = vmatpush.msra.mxu1 %v50_v46  ;;  %1272 = vmatpush.msra.mxu3 %v53_v40 }
  0x2d   :  { %273 = vmatpush.msra.mxu0 %v52_v42  ;;  %1274 = vmatpush.msra.mxu2 %v52_v42 }
  0x2e   :  { %1275 = vmatpush.msra.mxu3 %v52_v42 }
  0x2f   :  { %274 = vmatpush.msra.mxu0 %v51_v45  ;;  %1277 = vmatpush.msra.mxu2 %v51_v45 }
  0x30   :  { %1278 = vmatpush.msra.mxu3 %v51_v45 }
  0x31   :  { %275 = vmatpush.msra.mxu0 %v50_v46  ;;  %1280 = vmatpush.msra.mxu2 %v50_v46 }
  0x32   :  { %129 = vperm.xlu2 %1289, %v38_v21   ;;  %1281 = vmatpush.msra.mxu3 %v50_v46 }
  0x33   :  { %102 = vperm.xlu1 %1288, %v29_v22   ;;  %150 = vperm.xlu0 %1287, %v45_v23  }
  0x3a   :  { %132 = vperm.xlu2 %1289, %v39_v27  }
  0x3b   :  { %105 = vperm.xlu1 %1288, %v30_v29   ;;  %153 = vperm.xlu0 %1287, %v46_v30  }
  0x42   :  { %135 = vperm.xlu2 %1289, %v40_v34  }
  0x43   :  { %108 = vperm.xlu1 %1288, %v31_v36   ;;  %156 = vperm.xlu0 %1287, %v47_v37  }
  0x4a   :  { %138 = vperm.xlu2 %1289, %v41_v41  }
  0x4b   :  { %111 = vperm.xlu1 %1288, %v32_v43   ;;  %159 = vperm.xlu0 %1287, %v48_v44  }
  0x53   :  { %114 = vperm.xlu1 %1288, %v33_v47   ;;  %162 = vperm.xlu0 %1287, %v49_v48  }
  0x5c   :  { %v82_v49 = vpop.permute.xlu2 %81 }
  0x5d   :  { %vm168_vm7 = vcmp.eq.s32.totalorder %v82_v49, %v1558_v52 }
  0x64   :  { %v85_v50 = vpop.permute.xlu2 %84 }
  0x65   :  { %vm169_vm11 = vcmp.eq.s32.totalorder %v85_v50, %v1558_v52 }
  0x6c   :  { %v94_v53 = vpop.permute.xlu2 %93 }
  0x6d   :  { %vm172_vm0 = vcmp.eq.s32.totalorder %v94_v53, %v1558_v52 }
  0x6e   :  { %1210 = vmatmul.msk.f32.vlgmr.msra.gmra.mxu1 %vm172_vm0, %v1385_v54 }
  0x74   :  { %v121_v61 = vpop.permute.xlu2 %120 }
  0x75   :  { %v76_v55 = vpop.permute.xlu1 %75  ;;  %v70_v56 = vpop.permute.xlu0 %69  ;;  %vm181_vm10 = vcmp.eq.s32.totalorder %v121_v61, %v1558_v52 }
  0x76   :  { %vm164_vm1 = vcmp.eq.s32.totalorder %v70_v56, %v1558_v52  ;;  %vm166_vm3 = vcmp.eq.s32.totalorder %v76_v55, %v1558_v52 }
  0x77   :  { %1202 = vmatmul.msk.f32.vlgmr.msra.gmra.mxu0 %vm164_vm1, %v1385_v54 }
  0x7c   :  { %v124_v0 = vpop.permute.xlu2 %123 }
  0x7d   :  { %v79_v57 = vpop.permute.xlu1 %78  ;;  %v73_v58 = vpop.permute.xlu0 %72  ;;  %vm182_vm14 = vcmp.eq.s32.totalorder %v124_v0, %v1558_v52 }
  0x7e   :  { %vm165_vm2 = vcmp.eq.s32.totalorder %v73_v58, %v1558_v52  ;;  %vm167_vm4 = vcmp.eq.s32.totalorder %v79_v57, %v1558_v52 }
  0x7f   :  { %1203 = vmatmul.msk.f32.gmra.mxu0 %vm165_vm2, %v1385_v54 }
  0x84   :  { %v127_v3 = vpop.permute.xlu2 %126 }
  0x85   :  { %v91_v59 = vpop.permute.xlu1 %90  ;;  %v88_v60 = vpop.permute.xlu0 %87  ;;  %vm183_vm2 = vcmp.eq.s32.totalorder %v127_v3, %v1558_v52 }
  0x86   :  { %vm170_vm15 = vcmp.eq.s32.totalorder %v88_v60, %v1558_v52 }
  0x87   :  { %1204 = vmatmul.msk.f32.gmra.mxu0 %vm166_vm3, %v1385_v54  ;;  %vm171_vm3 = vcmp.eq.s32.totalorder %v91_v59, %v1558_v52 }
  0x8c   :  { %v130_v8 = vpop.permute.xlu2 %129 }
  0x8d   :  { %v142_v62 = vpop.permute.xlu1 %141  ;;  %v118_v63 = vpop.permute.xlu0 %117 }
  0x8e   :  { %vm188_vm5 = vcmp.eq.s32.totalorder %v142_v62, %v1558_v52  ;;  %vm180_vm6 = vcmp.eq.s32.totalorder %v118_v63, %v1558_v52 }
  0x8f   :  { %1205 = vmatmul.msk.f32.gmra.mxu0 %vm167_vm4, %v1385_v54  ;;  %1218 = vmatmul.msk.f32.vlgmr.msra.gmra.mxu2 %vm180_vm6, %v1385_v54  ;;  %vm184_vm6 = vcmp.eq.s32.totalorder %v130_v8, %v1558_v52 }
  0x90   :  { %1226 = vmatmul.msk.f32.vlgmr.msra.gmra.mxu3 %vm188_vm5, %v1385_v54 }
  0x94   :  { %v133_v11 = vpop.permute.xlu2 %132 }
  0x95   :  { %v97_v1 = vpop.permute.xlu1 %96  ;;  %v145_v2 = vpop.permute.xlu0 %144 }
  0x96   :  { %vm173_vm8 = vcmp.eq.s32.totalorder %v97_v1, %v1558_v52  ;;  %vm189_vm9 = vcmp.eq.s32.totalorder %v145_v2, %v1558_v52 }
  0x97   :  { %1206 = vmatmul.msk.f32.gmra.mxu0 %vm168_vm7, %v1385_v54  ;;  %1211 = vmatmul.msk.f32.gmra.mxu1 %vm173_vm8, %v1385_v54 }
  0x98   :  { %1219 = vmatmul.msk.f32.gmra.mxu2 %vm181_vm10, %v1385_v54  ;;  %1227 = vmatmul.msk.f32.gmra.mxu3 %vm189_vm9, %v1385_v54  ;;  %vm185_vm9 = vcmp.eq.s32.totalorder %v133_v11, %v1558_v52 }
  0x9c   :  { %v136_v14 = vpop.permute.xlu2 %135 }
  0x9d   :  { %v100_v4 = vpop.permute.xlu1 %99  ;;  %v148_v5 = vpop.permute.xlu0 %147 }
  0x9e   :  { %vm174_vm12 = vcmp.eq.s32.totalorder %v100_v4, %v1558_v52  ;;  %vm190_vm13 = vcmp.eq.s32.totalorder %v148_v5, %v1558_v52 }
  0x9f   :  { %1207 = vmatmul.msk.f32.gmra.mxu0 %vm169_vm11, %v1385_v54  ;;  %1212 = vmatmul.msk.f32.gmra.mxu1 %vm174_vm12, %v1385_v54  ;;  %vm186_vm12 = vcmp.eq.s32.totalorder %v136_v14, %v1558_v52 }
  0xa0   :  { %1220 = vmatmul.msk.f32.gmra.mxu2 %vm182_vm14, %v1385_v54  ;;  %1228 = vmatmul.msk.f32.gmra.mxu3 %vm190_vm13, %v1385_v54 }
  0xa4   :  { %v139_v17 = vpop.permute.xlu2 %138 }
  0xa5   :  { %v103_v6 = vpop.permute.xlu1 %102  ;;  %v151_v7 = vpop.permute.xlu0 %150 }
  0xa6   :  { %vm175_vm0 = vcmp.eq.s32.totalorder %v103_v6, %v1558_v52  ;;  %vm191_vm1 = vcmp.eq.s32.totalorder %v151_v7, %v1558_v52 }
  0xa7   :  { %1208 = vmatmul.msk.f32.gmra.mxu0 %vm170_vm15, %v1385_v54  ;;  %1213 = vmatmul.msk.f32.gmra.mxu1 %vm175_vm0, %v1385_v54  ;;  %vm187_vm15 = vcmp.eq.s32.totalorder %v139_v17, %v1558_v52  ;;  %vm501_vm0 = vcmp.lt.s32.totalorder %v1558_v52, 32 }
  0xa8   :  { %1221 = vmatmul.msk.f32.gmra.mxu2 %vm183_vm2, %v1385_v54  ;;  %1229 = vmatmul.msk.f32.gmra.mxu3 %vm191_vm1, %v1385_v54 }
  0xad   :  { %v106_v9 = vpop.permute.xlu1 %105  ;;  %v154_v10 = vpop.permute.xlu0 %153 }
  0xae   :  { %vm176_vm4 = vcmp.eq.s32.totalorder %v106_v9, %v1558_v52  ;;  %vm192_vm5 = vcmp.eq.s32.totalorder %v154_v10, %v1558_v52 }
  0xaf   :  { %1209 = vmatmul.msk.f32.gmra.mxu0 %vm171_vm3, %v1385_v54  ;;  %1214 = vmatmul.msk.f32.gmra.mxu1 %vm176_vm4, %v1385_v54 }
  0xb0   :  { %1222 = vmatmul.msk.f32.gmra.mxu2 %vm184_vm6, %v1385_v54  ;;  %1230 = vmatmul.msk.f32.gmra.mxu3 %vm192_vm5, %v1385_v54 }
  0xb5   :  { %v109_v12 = vpop.permute.xlu1 %108  ;;  %v157_v13 = vpop.permute.xlu0 %156 }
  0xb6   :  { %vm177_vm7 = vcmp.eq.s32.totalorder %v109_v12, %v1558_v52  ;;  %vm193_vm8 = vcmp.eq.s32.totalorder %v157_v13, %v1558_v52 }
  0xb7   :  { %1215 = vmatmul.msk.f32.gmra.mxu1 %vm177_vm7, %v1385_v54 }
  0xb8   :  { %1223 = vmatmul.msk.f32.gmra.mxu2 %vm185_vm9, %v1385_v54  ;;  %1231 = vmatmul.msk.f32.gmra.mxu3 %vm193_vm8, %v1385_v54 }
  0xbd   :  { %v112_v15 = vpop.permute.xlu1 %111  ;;  %v160_v16 = vpop.permute.xlu0 %159 }
  0xbe   :  { %vm178_vm10 = vcmp.eq.s32.totalorder %v112_v15, %v1558_v52  ;;  %vm194_vm11 = vcmp.eq.s32.totalorder %v160_v16, %v1558_v52 }
  0xbf   :  { %1216 = vmatmul.msk.f32.gmra.mxu1 %vm178_vm10, %v1385_v54 }
  0xc0   :  { %1224 = vmatmul.msk.f32.gmra.mxu2 %vm186_vm12, %v1385_v54  ;;  %1232 = vmatmul.msk.f32.gmra.mxu3 %vm194_vm11, %v1385_v54 }
  0xc5   :  { %v115_v18 = vpop.permute.xlu1 %114  ;;  %v163_v19 = vpop.permute.xlu0 %162 }
  0xc6   :  { %vm179_vm13 = vcmp.eq.s32.totalorder %v115_v18, %v1558_v52  ;;  %vm195_vm14 = vcmp.eq.s32.totalorder %v163_v19, %v1558_v52 }
  0xc7   :  { %1217 = vmatmul.msk.f32.gmra.mxu1 %vm179_vm13, %v1385_v54 }
  0xc8   :  { %1225 = vmatmul.msk.f32.gmra.mxu2 %vm187_vm15, %v1385_v54  ;;  %1233 = vmatmul.msk.f32.gmra.mxu3 %vm195_vm14, %v1385_v54 }
  0xeb   :  { %v1624_v20 = vpop.f32.mrf.mxu1 }
  0xec   :  { %389 = vadd.xlane.f32.xlu0 %v1624_v20 }
  0xf4   :  { %v1627_v21 = vpop.f32.mrf.mxu0 }
  0xf5   :  { %373 = vadd.xlane.f32.xlu2 %v1627_v21 }
  0xfc   :  { %v1630_v22 = vpop.f32.mrf.mxu0 }
  0xfd   :  { %375 = vadd.xlane.f32.xlu0 %v1630_v22 }
 0x104   :  { %v1647_v28 = vpop.f32.mrf.mxu0 }
 0x10c   :  { %v1659_v32 = vpop.f32.mrf.mxu0 }
 0x112   :  { %v1633_v23 = vpop.f32.mrf.mxu2 }
 0x113   :  { %v1635_v24 = vpop.f32.mrf.mxu3  ;;  %405 = vadd.xlane.f32.xlu2 %v1633_v23 }
 0x114   :  { %421 = vadd.xlane.f32.xlu1 %v1635_v24  ;;  %v1639_v25 = vpop.f32.mrf.mxu1  ;;  %v1670_v36 = vpop.f32.mrf.mxu0 }
 0x11b   :  { %v1641_v26 = vpop.f32.mrf.mxu2  ;;  %v1643_v27 = vpop.f32.mrf.mxu3 }
 0x11c   :  { %391 = vadd.xlane.f32.xlu1 %v1639_v25  ;;  %407 = vadd.xlane.f32.xlu0 %v1641_v26  ;;  %v1650_v29 = vpop.f32.mrf.mxu1  ;;  %v1681_v40 = vpop.f32.mrf.mxu0 }
 0x11d   :  { %423 = vadd.xlane.f32.xlu2 %v1643_v27 }
 0x123   :  { %v1652_v30 = vpop.f32.mrf.mxu2  ;;  %v1654_v31 = vpop.f32.mrf.mxu3 }
 0x124   :  { %377 = vadd.xlane.f32.xlu1 %v1647_v28  ;;  %425 = vadd.xlane.f32.xlu0 %v1654_v31  ;;  %v1661_v33 = vpop.f32.mrf.mxu1  ;;  %v1697_v45 = vpop.f32.mrf.mxu0 }
 0x125   :  { %393 = vadd.xlane.f32.xlu2 %v1650_v29 }
 0x12b   :  { %v1663_v34 = vpop.f32.mrf.mxu2  ;;  %v1668_v35 = vpop.f32.mrf.mxu3 }
 0x12c   :  { %409 = vadd.xlane.f32.xlu1 %v1652_v30  ;;  %395 = vadd.xlane.f32.xlu0 %v1661_v33  ;;  %v1677_v38 = vpop.f32.mrf.mxu1  ;;  %v1713_v50 = vpop.f32.mrf.mxu0 }
 0x12d   :  { %379 = vadd.xlane.f32.xlu2 %v1659_v32 }
 0x133   :  { %v1672_v37 = vpop.f32.mrf.mxu2  ;;  %v1679_v39 = vpop.f32.mrf.mxu3 }
 0x134   :  { %413 = vadd.xlane.f32.xlu0 %v1672_v37  ;;  %427 = vadd.xlane.f32.xlu1 %v1668_v35  ;;  %v1688_v42 = vpop.f32.mrf.mxu1 }
 0x135   :  { %411 = vadd.xlane.f32.xlu2 %v1663_v34 }
 0x13b   :  { %v1686_v41 = vpop.f32.mrf.mxu2  ;;  %v1690_v43 = vpop.f32.mrf.mxu3 }
 0x13c   :  { %383 = vadd.xlane.f32.xlu0 %v1681_v40  ;;  %397 = vadd.xlane.f32.xlu1 %v1677_v38  ;;  %v1699_v46 = vpop.f32.mrf.mxu1 }
 0x13d   :  { %381 = vadd.xlane.f32.xlu2 %v1670_v36 }
 0x143   :  { %v1695_v44 = vpop.f32.mrf.mxu2  ;;  %v1704_v47 = vpop.f32.mrf.mxu3 }
 0x144   :  { %415 = vadd.xlane.f32.xlu1 %v1686_v41  ;;  %431 = vadd.xlane.f32.xlu0 %v1690_v43  ;;  %v1711_v49 = vpop.f32.mrf.mxu1 }
 0x145   :  { %429 = vadd.xlane.f32.xlu2 %v1679_v39 }
 0x14b   :  { %v1706_v48 = vpop.f32.mrf.mxu2  ;;  %v1717_v54 = vpop.f32.mrf.mxu3 }
 0x14c   :  { %385 = vadd.xlane.f32.xlu1 %v1697_v45  ;;  %401 = vadd.xlane.f32.xlu0 %v1699_v46 }
 0x14d   :  { %399 = vadd.xlane.f32.xlu2 %v1688_v42 }
 0x154   :  { %419 = vadd.xlane.f32.xlu0 %v1706_v48  ;;  %433 = vadd.xlane.f32.xlu1 %v1704_v47 }
 0x155   :  { %417 = vadd.xlane.f32.xlu2 %v1695_v44 }
 0x15c   :  { %403 = vadd.xlane.f32.xlu1 %v1711_v49 }
 0x15d   :  { %387 = vadd.xlane.f32.xlu2 %v1713_v50 }
 0x15f   :  { %v390_v51 = vpop.xlane.xlu0 %389 }
 0x160   :  { %v445_v53 = vmul.f32 0.03125, %v390_v51 }
 0x162   :  { %v1720_v55 = vsub.f32 %v1624_v20, %v445_v53 }
 0x164   :  { %v512_v57 = vsel %vm501_vm0, %v1720_v55, 0.0 }
 0x165   :  { %435 = vadd.xlane.f32.xlu2 %v1717_v54  ;;  %v544_v60 = vmul.f32 %v512_v57, %v512_v57 }
 0x168   :  { %v374_v56 = vpop.xlane.xlu2 %373 }
 0x169   :  { %v437_v58 = vmul.f32 0.03125, %v374_v56 }
 0x16b   :  { %v1728_v59 = vsub.f32 %v1627_v21, %v437_v58 }
 0x16d   :  { %584 = vadd.xlane.f32.xlu2 %v544_v60  ;;  %v504_v61 = vsel %vm501_vm0, %v1728_v59, 0.0 }
 0x16e   :  { %v536_v62 = vmul.f32 %v504_v61, %v504_v61 }
 0x170   :  { %568 = vadd.xlane.f32.xlu0 %v536_v62  ;;  %v376_v63 = vpop.xlane.xlu0 %375 }
 0x171   :  { %v438_v4 = vmul.f32 0.03125, %v376_v63 }
 0x173   :  { %v1746_v10 = vsub.f32 %v1630_v22, %v438_v4 }
 0x175   :  { %v505_v18 = vsel %vm501_vm0, %v1746_v10, 0.0 }
 0x176   :  { %v537_v22 = vmul.f32 %v505_v18, %v505_v18 }
 0x186   :  { %v406_v0 = vpop.xlane.xlu2 %405 }
 0x187   :  { %v422_v1 = vpop.xlane.xlu1 %421  ;;  %v453_v2 = vmul.f32 0.03125, %v406_v0 }
 0x188   :  { %v461_v3 = vmul.f32 0.03125, %v422_v1 }
 0x189   :  { %v1734_v5 = vsub.f32 %v1633_v23, %v453_v2 }
 0x18a   :  { %v1737_v6 = vsub.f32 %v1635_v24, %v461_v3 }
 0x18b   :  { %v520_v7 = vsel %vm501_vm0, %v1734_v5, 0.0 }
 0x18c   :  { %v528_v8 = vsel %vm501_vm0, %v1737_v6, 0.0  ;;  %v552_v9 = vmul.f32 %v520_v7, %v520_v7 }
 0x18d   :  { %v560_v11 = vmul.f32 %v528_v8, %v528_v8 }
 0x18e   :  { %600 = vadd.xlane.f32.xlu1 %v552_v9 }
 0x18f   :  { %v392_v12 = vpop.xlane.xlu1 %391  ;;  %616 = vadd.xlane.f32.xlu0 %v560_v11  ;;  %v408_v13 = vpop.xlane.xlu0 %407 }
 0x190   :  { %v446_v14 = vmul.f32 0.03125, %v392_v12  ;;  %v424_v15 = vpop.xlane.xlu2 %423  ;;  %v454_v16 = vmul.f32 0.03125, %v408_v13 }
 0x191   :  { %v462_v17 = vmul.f32 0.03125, %v424_v15 }
 0x192   :  { %v1752_v19 = vsub.f32 %v1639_v25, %v446_v14  ;;  %v1755_v20 = vsub.f32 %v1641_v26, %v454_v16 }
 0x193   :  { %v1764_v24 = vsub.f32 %v1643_v27, %v462_v17 }
 0x194   :  { %v513_v21 = vsel %vm501_vm0, %v1752_v19, 0.0  ;;  %v521_v23 = vsel %vm501_vm0, %v1755_v20, 0.0 }
 0x195   :  { %v545_v51 = vmul.f32 %v513_v21, %v513_v21  ;;  %v553_v53 = vmul.f32 %v521_v23, %v521_v23  ;;  %v529_v60 = vsel %vm501_vm0, %v1764_v24, 0.0 }
 0x196   :  { %570 = vadd.xlane.f32.xlu1 %v537_v22  ;;  %v561_v27 = vmul.f32 %v529_v60, %v529_v60 }
 0x197   :  { %v378_v25 = vpop.xlane.xlu1 %377  ;;  %586 = vadd.xlane.f32.xlu0 %v545_v51  ;;  %602 = vadd.xlane.f32.xlu2 %v553_v53  ;;  %v426_v26 = vpop.xlane.xlu0 %425 }
 0x198   :  { %v439_v56 = vmul.f32 0.03125, %v378_v25  ;;  %v394_v57 = vpop.xlane.xlu2 %393  ;;  %v463_v62 = vmul.f32 0.03125, %v426_v26 }
 0x199   :  { %v447_v58 = vmul.f32 0.03125, %v394_v57 }
 0x19a   :  { %v1770_v61 = vsub.f32 %v1647_v28, %v439_v56  ;;  %v1779_v2 = vsub.f32 %v1654_v31, %v463_v62 }
 0x19b   :  { %v1776_v0 = vsub.f32 %v1650_v29, %v447_v58 }
 0x19c   :  { %v506_v63 = vsel %vm501_vm0, %v1770_v61, 0.0  ;;  %v530_v31 = vsel %vm501_vm0, %v1779_v2, 0.0 }
 0x19d   :  { %v538_v1 = vmul.f32 %v506_v63, %v506_v63  ;;  %v514_v8 = vsel %vm501_vm0, %v1776_v0, 0.0  ;;  %v562_v15 = vmul.f32 %v530_v31, %v530_v31 }
 0x19e   :  { %618 = vadd.xlane.f32.xlu1 %v561_v27  ;;  %v546_v13 = vmul.f32 %v514_v8, %v514_v8 }
 0x19f   :  { %v410_v3 = vpop.xlane.xlu1 %409  ;;  %572 = vadd.xlane.f32.xlu2 %v538_v1  ;;  %v396_v4 = vpop.xlane.xlu0 %395 }
 0x1a0   :  { %v455_v7 = vmul.f32 0.03125, %v410_v3  ;;  %v380_v28 = vpop.xlane.xlu2 %379  ;;  %v448_v29 = vmul.f32 0.03125, %v396_v4 }
 0x1a1   :  { %v440_v11 = vmul.f32 0.03125, %v380_v28 }
 0x1a2   :  { %v1785_v9 = vsub.f32 %v1652_v30, %v455_v7  ;;  %v1797_v17 = vsub.f32 %v1661_v33, %v448_v29 }
 0x1a3   :  { %v1794_v16 = vsub.f32 %v1659_v32, %v440_v11 }
 0x1a4   :  { %v522_v12 = vsel %vm501_vm0, %v1785_v9, 0.0  ;;  %v515_v32 = vsel %vm501_vm0, %v1797_v17, 0.0 }
 0x1a5   :  { %v554_v14 = vmul.f32 %v522_v12, %v522_v12  ;;  %v507_v53 = vsel %vm501_vm0, %v1794_v16, 0.0  ;;  %v547_v56 = vmul.f32 %v515_v32, %v515_v32 }
 0x1a6   :  { %588 = vadd.xlane.f32.xlu1 %v546_v13  ;;  %v539_v25 = vmul.f32 %v507_v53, %v507_v53 }
 0x1a7   :  { %v428_v30 = vpop.xlane.xlu1 %427  ;;  %604 = vadd.xlane.f32.xlu0 %v554_v14  ;;  %620 = vadd.xlane.f32.xlu2 %v562_v15  ;;  %v414_v18 = vpop.xlane.xlu0 %413 }
 0x1a8   :  { %v412_v21 = vpop.xlane.xlu2 %411  ;;  %v464_v23 = vmul.f32 0.03125, %v428_v30  ;;  %v457_v51 = vmul.f32 0.03125, %v414_v18 }
 0x1a9   :  { %v456_v22 = vmul.f32 0.03125, %v412_v21 }
 0x1aa   :  { %v1812_v57 = vsub.f32 %v1668_v35, %v464_v23  ;;  %v1815_v58 = vsub.f32 %v1672_v37, %v457_v51 }
 0x1ab   :  { %v1806_v33 = vsub.f32 %v1663_v34, %v456_v22 }
 0x1ac   :  { %v531_v4 = vsel %vm501_vm0, %v1812_v57, 0.0  ;;  %v524_v35 = vsel %vm501_vm0, %v1815_v58, 0.0 }
 0x1ad   :  { %v523_v26 = vsel %vm501_vm0, %v1806_v33, 0.0  ;;  %v563_v7 = vmul.f32 %v531_v4, %v531_v4  ;;  %v556_v8 = vmul.f32 %v524_v35, %v524_v35 }
 0x1ae   :  { %v555_v60 = vmul.f32 %v523_v26, %v523_v26 }
 0x1af   :  { %v398_v62 = vpop.xlane.xlu1 %397  ;;  %574 = vadd.xlane.f32.xlu0 %v539_v25  ;;  %590 = vadd.xlane.f32.xlu2 %v547_v56  ;;  %v384_v27 = vpop.xlane.xlu0 %383 }
 0x1b0   :  { %v382_v63 = vpop.xlane.xlu2 %381  ;;  %606 = vadd.xlane.f32.xlu1 %v555_v60  ;;  %v449_v1 = vmul.f32 0.03125, %v398_v62  ;;  %v442_v3 = vmul.f32 0.03125, %v384_v27 }
 0x1b1   :  { %v441_v34 = vmul.f32 0.03125, %v382_v63 }
 0x1b2   :  { %v1830_v11 = vsub.f32 %v1677_v38, %v449_v1  ;;  %v1833_v29 = vsub.f32 %v1681_v40, %v442_v3 }
 0x1b3   :  { %v1824_v37 = vsub.f32 %v1670_v36, %v441_v34 }
 0x1b4   :  { %v516_v30 = vsel %vm501_vm0, %v1830_v11, 0.0  ;;  %v509_v38 = vsel %vm501_vm0, %v1833_v29, 0.0 }
 0x1b5   :  { %v508_v28 = vsel %vm501_vm0, %v1824_v37, 0.0  ;;  %v548_v18 = vmul.f32 %v516_v30, %v516_v30  ;;  %v541_v22 = vmul.f32 %v509_v38, %v509_v38 }
 0x1b6   :  { %v540_v31 = vmul.f32 %v508_v28, %v508_v28 }
 0x1b7   :  { %v416_v12 = vpop.xlane.xlu1 %415  ;;  %622 = vadd.xlane.f32.xlu0 %v563_v7  ;;  %608 = vadd.xlane.f32.xlu2 %v556_v8  ;;  %v432_v13 = vpop.xlane.xlu0 %431 }
 0x1b8   :  { %v430_v14 = vpop.xlane.xlu2 %429  ;;  %576 = vadd.xlane.f32.xlu1 %v540_v31  ;;  %v458_v15 = vmul.f32 0.03125, %v416_v12  ;;  %v466_v8 = vmul.f32 0.03125, %v432_v13 }
 0x1b9   :  { %v465_v36 = vmul.f32 0.03125, %v430_v14 }
 0x1ba   :  { %v1848_v23 = vsub.f32 %v1686_v41, %v458_v15 }
 0x1bb   :  { %v1842_v40 = vsub.f32 %v1679_v39, %v465_v36 }
 0x1bc   :  { %v525_v62 = vsel %vm501_vm0, %v1848_v23, 0.0 }
 0x1bd   :  { %v532_v21 = vsel %vm501_vm0, %v1842_v40, 0.0  ;;  %v557_v63 = vmul.f32 %v525_v62, %v525_v62 }
 0x1be   :  { %v564_v51 = vmul.f32 %v532_v21, %v532_v21 }
 0x1bf   :  { %v386_v53 = vpop.xlane.xlu1 %385  ;;  %592 = vadd.xlane.f32.xlu0 %v548_v18  ;;  %578 = vadd.xlane.f32.xlu2 %v541_v22  ;;  %v402_v32 = vpop.xlane.xlu0 %401 }
 0x1c0   :  { %v400_v25 = vpop.xlane.xlu2 %399  ;;  %624 = vadd.xlane.f32.xlu1 %v564_v51  ;;  %v451_v26 = vmul.f32 0.03125, %v402_v32  ;;  %v443_v39 = vmul.f32 0.03125, %v386_v53 }
 0x1c1   :  { %v450_v56 = vmul.f32 0.03125, %v400_v25 }
 0x1c2   :  { %v1851_v60 = vsub.f32 %v1699_v46, %v451_v26  ;;  %v1866_v46 = vsub.f32 %v1697_v45, %v443_v39 }
 0x1c3   :  { %v1857_v41 = vsub.f32 %v1688_v42, %v450_v56 }
 0x1c4   :  { %v518_v27 = vsel %vm501_vm0, %v1851_v60, 0.0  ;;  %v510_v12 = vsel %vm501_vm0, %v1866_v46, 0.0 }
 0x1c5   :  { %v517_v34 = vsel %vm501_vm0, %v1857_v41, 0.0  ;;  %v550_v1 = vmul.f32 %v518_v27, %v518_v27  ;;  %v542_v36 = vmul.f32 %v510_v12, %v510_v12 }
 0x1c6   :  { %v549_v3 = vmul.f32 %v517_v34, %v517_v34 }
 0x1c7   :  { %610 = vadd.xlane.f32.xlu0 %v557_v63  ;;  %v434_v4 = vpop.xlane.xlu1 %433  ;;  %596 = vadd.xlane.f32.xlu2 %v550_v1  ;;  %v420_v35 = vpop.xlane.xlu0 %419 }
 0x1c8   :  { %v418_v42 = vpop.xlane.xlu2 %417  ;;  %594 = vadd.xlane.f32.xlu1 %v549_v3  ;;  %v460_v7 = vmul.f32 0.03125, %v420_v35  ;;  %v467_v22 = vmul.f32 0.03125, %v434_v4 }
 0x1c9   :  { %v459_v28 = vmul.f32 0.03125, %v418_v42 }
 0x1ca   :  { %v1869_v31 = vsub.f32 %v1706_v48, %v460_v7  ;;  %v1884_v48 = vsub.f32 %v1690_v43, %v466_v8 }
 0x1cb   :  { %v1875_v45 = vsub.f32 %v1695_v44, %v459_v28 }
 0x1cc   :  { %v527_v14 = vsel %vm501_vm0, %v1869_v31, 0.0  ;;  %v533_v53 = vsel %vm501_vm0, %v1884_v48, 0.0 }
 0x1cd   :  { %v526_v15 = vsel %vm501_vm0, %v1875_v45, 0.0  ;;  %v559_v13 = vmul.f32 %v527_v14, %v527_v14  ;;  %v565_v56 = vmul.f32 %v533_v53, %v533_v53 }
 0x1ce   :  { %v558_v30 = vmul.f32 %v526_v15, %v526_v15 }
 0x1cf   :  { %580 = vadd.xlane.f32.xlu0 %v542_v36  ;;  %v404_v38 = vpop.xlane.xlu1 %403  ;;  %614 = vadd.xlane.f32.xlu2 %v559_v13 }
 0x1d0   :  { %v388_v18 = vpop.xlane.xlu2 %387  ;;  %v452_v44 = vmul.f32 0.03125, %v404_v38  ;;  %612 = vadd.xlane.f32.xlu1 %v558_v30  ;;  %v1916_v30 = vld [vmem:[%s2324_s2] ss:$0 sm:$0xff] }
 0x1d1   :  { %v444_v21 = vmul.f32 0.03125, %v388_v18 }
 0x1d2   :  { %v1887_v51 = vsub.f32 %v1711_v49, %v452_v44  ;;  %v1902_v49 = vsub.f32 %v1704_v47, %v467_v22  ;;  %v1921_v22 = vld [vmem:[%s2325_s3] ss:$0 sm:$0xff] }
 0x1d3   :  { %v1893_v32 = vsub.f32 %v1713_v50, %v444_v21 }
 0x1d4   :  { %v519_v43 = vsel %vm501_vm0, %v1887_v51, 0.0  ;;  %v534_v27 = vsel %vm501_vm0, %v1902_v49, 0.0 }
 0x1d5   :  { %v551_v25 = vmul.f32 %v519_v43, %v519_v43  ;;  %v511_v26 = vsel %vm501_vm0, %v1893_v32, 0.0  ;;  %v566_v34 = vmul.f32 %v534_v27, %v534_v27 }
 0x1d6   :  { %v543_v39 = vmul.f32 %v511_v26, %v511_v26 }
 0x1d7   :  { %598 = vadd.xlane.f32.xlu0 %v551_v25  ;;  %626 = vadd.xlane.f32.xlu2 %v565_v56 }
 0x1d8   :  { %v436_v62 = vpop.xlane.xlu2 %435  ;;  %582 = vadd.xlane.f32.xlu1 %v543_v39 }
 0x1d9   :  { %v468_v50 = vmul.f32 0.03125, %v436_v62 }
 0x1db   :  { %v1908_v63 = vsub.f32 %v1717_v54, %v468_v50 }
 0x1dd   :  { %v535_v1 = vsel %vm501_vm0, %v1908_v63, 0.0 }
 0x1de   :  { %v567_v47 = vmul.f32 %v535_v1, %v535_v1 }
 0x1df   :  { %628 = vadd.xlane.f32.xlu0 %v566_v34 }
 0x1e0   :  { %v585_v3 = vpop.xlane.xlu2 %584  ;;  %630 = vadd.xlane.f32.xlu1 %v567_v47 }
 0x1e1   :  { %v640_v4 = vmul.f32 0.03125, %v585_v3 }
 0x1e3   :  { %v672_v35 = vadd.f32 1e-05, %v640_v4  ;;  %v569_v42 = vpop.xlane.xlu0 %568 }
 0x1e4   :  { %v632_v7 = vmul.f32 0.03125, %v569_v42 }
 0x1e5   :  { %1292 = vrsqrt.f32 %v672_v35  ;;  %vm782_vm2 = vweird.f32 %v672_v35 }
 0x1e6   :  { %v664_v28 = vadd.f32 1e-05, %v632_v7 }
 0x1e8   :  { %1294 = vrsqrt.f32 %v664_v28  ;;  %vm702_vm5 = vweird.f32 %v664_v28 }
 0x1eb   :  { %v1293_v8 = vpop.eup %1292 }
 0x1ec   :  { %v777_v12 = vmul.f32 %v1293_v8, %v672_v35  ;;  %vm783_vm1 = vweird.f32 %v1293_v8 }
 0x1ed   :  { %vm784_vm3 = vmor %vm782_vm2, %vm783_vm1 }
 0x1ee   :  { %v1295_v54 = vpop.eup %1294  ;;  %v778_v14 = vmul.f32 %v1293_v8, %v777_v12 }
 0x1ef   :  { %v697_v36 = vmul.f32 %v1295_v54, %v664_v28  ;;  %vm703_vm4 = vweird.f32 %v1295_v54 }
 0x1f0   :  { %v779_v15 = vmul.f32 0.5, %v778_v14  ;;  %vm704_vm6 = vmor %vm702_vm5, %vm703_vm4 }
 0x1f1   :  { %v698_v13 = vmul.f32 %v1295_v54, %v697_v36 }
 0x1f2   :  { %v780_v52 = vsub.f32 1.5, %v779_v15 }
 0x1f3   :  { %v699_v38 = vmul.f32 0.5, %v698_v13 }
 0x1f4   :  { %v781_v18 = vmul.f32 %v1293_v8, %v780_v52 }
 0x1f5   :  { %v700_v44 = vsub.f32 1.5, %v699_v38 }
 0x1f6   :  { %v785_v21 = vsel %vm784_vm3, %v1293_v8, %v781_v18 }
 0x1f7   :  { %v1028_v53 = vmul.f32 %v1916_v30, %v785_v21  ;;  %v701_v43 = vmul.f32 %v1295_v54, %v700_v44 }
 0x1f9   :  { %v1060_v25 = vmul.f32 %v1028_v53, %v1720_v55  ;;  %v705_v26 = vsel %vm704_vm6, %v1295_v54, %v701_v43 }
 0x1fa   :  { %v1020_v56 = vmul.f32 %v1916_v30, %v705_v26 }
 0x1fb   :  { %v1096_v39 = vadd.f32 %v1921_v22, %v1060_v25 }
 0x1fc   :  { %v1052_v62 = vmul.f32 %v1020_v56, %v1728_v59 }
 0x1fd   :  { %1128 = vst [vmem:[#allocation2 + $0x40] sm:$0xff] %v1096_v39 }
 0x1fe   :  { %v1088_v50 = vadd.f32 %v1921_v22, %v1052_v62 }
 0x200   :  { %1120 = vst [vmem:[#allocation2] sm:$0xff] %v1088_v50 }
 0x201   :  { %v601_v27 = vpop.xlane.xlu1 %600 }
 0x202   :  { %v648_v34 = vmul.f32 0.03125, %v601_v27  ;;  %v617_v1 = vpop.xlane.xlu0 %616 }
 0x203   :  { %v656_v47 = vmul.f32 0.03125, %v617_v1 }
 0x204   :  { %v680_v3 = vadd.f32 1e-05, %v648_v34 }
 0x205   :  { %v688_v4 = vadd.f32 1e-05, %v656_v47 }
 0x206   :  { %1296 = vrsqrt.f32 %v680_v3  ;;  %vm862_vm8 = vweird.f32 %v680_v3 }
 0x207   :  { %1298 = vrsqrt.f32 %v688_v4  ;;  %vm942_vm10 = vweird.f32 %v688_v4 }
 0x209   :  { %v571_v55 = vpop.xlane.xlu1 %570 }
 0x20a   :  { %v633_v35 = vmul.f32 0.03125, %v571_v55  ;;  %v603_v42 = vpop.xlane.xlu2 %602  ;;  %v587_v7 = vpop.xlane.xlu0 %586 }
 0x20b   :  { %v649_v28 = vmul.f32 0.03125, %v603_v42  ;;  %v641_v8 = vmul.f32 0.03125, %v587_v7 }
 0x20c   :  { %v1297_v12 = vpop.eup %1296  ;;  %v1929_v59 = vadd.f32 1e-05, %v633_v35 }
 0x20d   :  { %v1299_v54 = vpop.eup %1298  ;;  %v857_v14 = vmul.f32 %v1297_v12, %v680_v3  ;;  %v1931_v36 = vadd.f32 1e-05, %v649_v28  ;;  %v1933_v15 = vadd.f32 1e-05, %v641_v8  ;;  %vm863_vm7 = vweird.f32 %v1297_v12 }
 0x20e   :  { %v937_v13 = vmul.f32 %v1299_v54, %v688_v4  ;;  %1300 = vrsqrt.f32 %v1929_v59  ;;  %vm943_vm9 = vweird.f32 %v1299_v54  ;;  %vm864_vm11 = vmor %vm862_vm8, %vm863_vm7  ;;  %vm712_vm12 = vweird.f32 %v1929_v59 }
 0x20f   :  { %v858_v52 = vmul.f32 %v1297_v12, %v857_v14  ;;  %1302 = vrsqrt.f32 %v1931_v36  ;;  %vm944_vm13 = vmor %vm942_vm10, %vm943_vm9  ;;  %vm872_vm14 = vweird.f32 %v1931_v36  ;;  %vm792_vm3 = vweird.f32 %v1933_v15 }
 0x210   :  { %v938_v38 = vmul.f32 %v1299_v54, %v937_v13  ;;  %1304 = vrsqrt.f32 %v1933_v15 }
 0x211   :  { %v859_v18 = vmul.f32 0.5, %v858_v52  ;;  %v619_v44 = vpop.xlane.xlu1 %618 }
 0x212   :  { %v939_v21 = vmul.f32 0.5, %v938_v38  ;;  %v657_v53 = vmul.f32 0.03125, %v619_v44  ;;  %v573_v43 = vpop.xlane.xlu2 %572 }
 0x213   :  { %v860_v25 = vsub.f32 1.5, %v859_v18  ;;  %v634_v26 = vmul.f32 0.03125, %v573_v43 }
 0x214   :  { %v1938_v56 = vpop.eup %1300  ;;  %v940_v39 = vsub.f32 1.5, %v939_v21  ;;  %v1940_v62 = vadd.f32 1e-05, %v657_v53 }
 0x215   :  { %v1303_v50 = vpop.eup %1302  ;;  %v861_v27 = vmul.f32 %v1297_v12, %v860_v25  ;;  %v707_v34 = vmul.f32 %v1938_v56, %v1929_v59  ;;  %v1944_v1 = vadd.f32 1e-05, %v634_v26  ;;  %vm713_vm15 = vweird.f32 %v1938_v56 }
 0x216   :  { %v1305_v47 = vpop.eup %1304  ;;  %v941_v55 = vmul.f32 %v1299_v54, %v940_v39  ;;  %v867_v35 = vmul.f32 %v1303_v50, %v1931_v36  ;;  %1306 = vrsqrt.f32 %v1940_v62  ;;  %vm873_vm0 = vweird.f32 %v1303_v50  ;;  %vm714_vm2 = vmor %vm712_vm12, %vm713_vm15 }
 0x217   :  { %v865_v3 = vsel %vm864_vm11, %v1297_v12, %v861_v27  ;;  %v708_v42 = vmul.f32 %v1938_v56, %v707_v34  ;;  %v787_v4 = vmul.f32 %v1305_v47, %v1933_v15  ;;  %1308 = vrsqrt.f32 %v1944_v1  ;;  %vm874_vm4 = vmor %vm872_vm14, %vm873_vm0 }
 0x218   :  { %v1036_v7 = vmul.f32 %v1916_v30, %v865_v3  ;;  %v945_v28 = vsel %vm944_vm13, %v1299_v54, %v941_v55  ;;  %v868_v8 = vmul.f32 %v1303_v50, %v867_v35  ;;  %vm793_vm1 = vweird.f32 %v1305_v47 }
 0x219   :  { %v1044_v14 = vmul.f32 %v1916_v30, %v945_v28  ;;  %v709_v13 = vmul.f32 0.5, %v708_v42  ;;  %v788_v52 = vmul.f32 %v1305_v47, %v787_v4  ;;  %v589_v12 = vpop.xlane.xlu1 %588  ;;  %vm794_vm5 = vmor %vm792_vm3, %vm793_vm1  ;;  %vm952_vm7 = vweird.f32 %v1940_v62 }
 0x21a   :  { %v1068_v38 = vmul.f32 %v1036_v7, %v1734_v5  ;;  %v869_v18 = vmul.f32 0.5, %v868_v8  ;;  %v642_v44 = vmul.f32 0.03125, %v589_v12  ;;  %v621_v21 = vpop.xlane.xlu2 %620  ;;  %v605_v53 = vpop.xlane.xlu0 %604  ;;  %vm722_vm10 = vweird.f32 %v1944_v1 }
 0x21b   :  { %v1076_v43 = vmul.f32 %v1044_v14, %v1737_v6  ;;  %v710_v54 = vsub.f32 1.5, %v709_v13  ;;  %v789_v25 = vmul.f32 0.5, %v788_v52  ;;  %v658_v26 = vmul.f32 0.03125, %v621_v21 }
 0x21c   :  { %v1958_v39 = vpop.eup %1306  ;;  %v1104_v27 = vadd.f32 %v1921_v22, %v1068_v38  ;;  %v870_v34 = vsub.f32 1.5, %v869_v18  ;;  %v1961_v55 = vadd.f32 1e-05, %v642_v44  ;;  %v650_v4 = vmul.f32 0.03125, %v605_v53 }
 0x21d   :  { %v1112_v5 = vadd.f32 %v1921_v22, %v1076_v43  ;;  %v711_v35 = vmul.f32 %v1938_v56, %v710_v54  ;;  %v790_v3 = vsub.f32 1.5, %v789_v25  ;;  %v947_v42 = vmul.f32 %v1958_v39, %v1940_v62  ;;  %v1309_v7 = vpop.eup %1308 }
 0x21e   :  { %1136 = vst [vmem:[#allocation2 + $0x80] sm:$0xff] %v1104_v27  ;;  %v871_v6 = vmul.f32 %v1303_v50, %v870_v34  ;;  %1310 = vrsqrt.f32 %v1961_v55  ;;  %v1978_v13 = vadd.f32 1e-05, %v658_v26  ;;  %v717_v15 = vmul.f32 %v1309_v7, %v1944_v1 }
 0x21f   :  { %1144 = vst [vmem:[#allocation2 + $0xc0] sm:$0xff] %v1112_v5  ;;  %v715_v28 = vsel %vm714_vm2, %v1938_v56, %v711_v35  ;;  %v791_v8 = vmul.f32 %v1305_v47, %v790_v3  ;;  %v948_v14 = vmul.f32 %v1958_v39, %v947_v42  ;;  %vm953_vm6 = vweird.f32 %v1958_v39 }
 0x220   :  { %v1021_v59 = vmul.f32 %v1916_v30, %v715_v28  ;;  %v875_v52 = vsel %vm874_vm4, %v1303_v50, %v871_v6  ;;  %1312 = vrsqrt.f32 %v1978_v13  ;;  %v718_v44 = vmul.f32 %v1309_v7, %v717_v15  ;;  %vm954_vm8 = vmor %vm952_vm7, %vm953_vm6 }
 0x221   :  { %v1037_v12 = vmul.f32 %v1916_v30, %v875_v52  ;;  %v795_v38 = vsel %vm794_vm5, %v1305_v47, %v791_v8  ;;  %v949_v56 = vmul.f32 0.5, %v948_v14  ;;  %v1989_v43 = vadd.f32 1e-05, %v650_v4 }
 0x222   :  { %v1053_v36 = vmul.f32 %v1021_v59, %v1746_v10  ;;  %v1029_v18 = vmul.f32 %v1916_v30, %v795_v38  ;;  %v591_v21 = vpop.xlane.xlu2 %590  ;;  %v719_v10 = vmul.f32 0.5, %v718_v44  ;;  %v575_v5 = vpop.xlane.xlu0 %574  ;;  %vm723_vm9 = vweird.f32 %v1309_v7 }
 0x223   :  { %v1069_v50 = vmul.f32 %v1037_v12, %v1755_v20  ;;  %v950_v53 = vsub.f32 1.5, %v949_v56  ;;  %v607_v54 = vpop.xlane.xlu1 %606  ;;  %v643_v25 = vmul.f32 0.03125, %v591_v21  ;;  %1314 = vrsqrt.f32 %v1989_v43  ;;  %vm724_vm11 = vmor %vm722_vm10, %vm723_vm9 }
 0x224   :  { %v1991_v26 = vpop.eup %1310  ;;  %v1089_v47 = vadd.f32 %v1921_v22, %v1053_v36  ;;  %v1061_v27 = vmul.f32 %v1029_v18, %v1752_v19  ;;  %v651_v34 = vmul.f32 0.03125, %v607_v54  ;;  %v720_v6 = vsub.f32 1.5, %v719_v10 }
 0x225   :  { %v1105_v35 = vadd.f32 %v1921_v22, %v1069_v50  ;;  %v951_v3 = vmul.f32 %v1958_v39, %v950_v53  ;;  %v797_v20 = vmul.f32 %v1991_v26, %v1961_v55  ;;  %v2008_v8 = vadd.f32 1e-05, %v643_v25 }
 0x226   :  { %1121 = vst [vmem:[#allocation2 + $0x8] sm:$0xff] %v1089_v47  ;;  %v1097_v42 = vadd.f32 %v1921_v22, %v1061_v27  ;;  %v1313_v19 = vpop.eup %1312  ;;  %v2006_v62 = vadd.f32 1e-05, %v651_v34  ;;  %v721_v59 = vmul.f32 %v1309_v7, %v720_v6  ;;  %vm802_vm12 = vweird.f32 %v1961_v55 }
 0x227   :  { %1137 = vst [vmem:[#allocation2 + $0x88] sm:$0xff] %v1105_v35  ;;  %v955_v4 = vsel %vm954_vm8, %v1958_v39, %v951_v3  ;;  %v798_v28 = vmul.f32 %v1991_v26, %v797_v20  ;;  %v957_v52 = vmul.f32 %v1313_v19, %v1978_v13  ;;  %vm803_vm13 = vweird.f32 %v1991_v26 }
 0x228   :  { %1129 = vst [vmem:[#allocation2 + $0x48] sm:$0xff] %v1097_v42  ;;  %v1045_v14 = vmul.f32 %v1916_v30, %v955_v4  ;;  %1316 = vrsqrt.f32 %v2006_v62  ;;  %v725_v12 = vsel %vm724_vm11, %v1309_v7, %v721_v59  ;;  %v635_v1 = vmul.f32 0.03125, %v575_v5  ;;  %vm804_vm15 = vmor %vm802_vm12, %vm803_vm13 }
 0x229   :  { %v799_v15 = vmul.f32 0.5, %v798_v28  ;;  %v958_v38 = vmul.f32 %v1313_v19, %v957_v52  ;;  %1318 = vrsqrt.f32 %v2008_v8  ;;  %v1022_v36 = vmul.f32 %v1916_v30, %v725_v12  ;;  %v1315_v21 = vpop.eup %1314 }
 0x22a   :  { %v1077_v39 = vmul.f32 %v1045_v14, %v1764_v24  ;;  %v609_v56 = vpop.xlane.xlu2 %608  ;;  %vm962_vm14 = vweird.f32 %v1978_v13  ;;  %v877_v47 = vmul.f32 %v1315_v21, %v1989_v43  ;;  %vm963_vm0 = vweird.f32 %v1313_v19  ;;  %v623_v34 = vpop.xlane.xlu0 %622 }
 0x22b   :  { %v800_v18 = vsub.f32 1.5, %v799_v15  ;;  %v577_v44 = vpop.xlane.xlu1 %576  ;;  %v959_v53 = vmul.f32 0.5, %v958_v38  ;;  %v652_v25 = vmul.f32 0.03125, %v609_v56  ;;  %v1054_v24 = vmul.f32 %v1022_v36, %v1770_v61  ;;  %vm964_vm2 = vmor %vm962_vm14, %vm963_vm0 }
 0x22c   :  { %v1113_v50 = vadd.f32 %v1921_v22, %v1077_v39  ;;  %v636_v54 = vmul.f32 0.03125, %v577_v44  ;;  %vm882_vm1 = vweird.f32 %v1989_v43  ;;  %v2027_v10 = vadd.f32 1e-05, %v635_v1 }
 0x22d   :  { %v801_v7 = vmul.f32 %v1991_v26, %v800_v18  ;;  %v960_v27 = vsub.f32 1.5, %v959_v53  ;;  %v1090_v61 = vadd.f32 %v1921_v22, %v1054_v24  ;;  %v878_v3 = vmul.f32 %v1315_v21, %v877_v47 }
 0x22e   :  { %1145 = vst [vmem:[#allocation2 + $0xc8] sm:$0xff] %v1113_v50  ;;  %v2029_v5 = vpop.eup %1316  ;;  %v2033_v20 = vadd.f32 1e-05, %v636_v54  ;;  %v2040_v28 = vadd.f32 1e-05, %v652_v25  ;;  %1320 = vrsqrt.f32 %v2027_v10  ;;  %v659_v59 = vmul.f32 0.03125, %v623_v34 }
 0x22f   :  { %v805_v35 = vsel %vm804_vm15, %v1991_v26, %v801_v7  ;;  %v2035_v42 = vpop.eup %1318  ;;  %v961_v6 = vmul.f32 %v1313_v19, %v960_v27  ;;  %v887_v4 = vmul.f32 %v2029_v5, %v2006_v62  ;;  %1122 = vst [vmem:[#allocation2 + $0x10] sm:$0xff] %v1090_v61  ;;  %v879_v14 = vmul.f32 0.5, %v878_v3 }
 0x230   :  { %v1030_v55 = vmul.f32 %v1916_v30, %v805_v35  ;;  %v807_v26 = vmul.f32 %v2035_v42, %v2008_v8  ;;  %vm883_vm3 = vweird.f32 %v1315_v21  ;;  %1322 = vrsqrt.f32 %v2033_v20 }
 0x231   :  { %v965_v15 = vsel %vm964_vm2, %v1313_v19, %v961_v6  ;;  %v888_v39 = vmul.f32 %v2029_v5, %v887_v4  ;;  %v880_v38 = vsub.f32 1.5, %v879_v14  ;;  %vm892_vm4 = vweird.f32 %v2006_v62  ;;  %vm884_vm6 = vmor %vm882_vm1, %vm883_vm3 }
 0x232   :  { %v1062_v52 = vmul.f32 %v1030_v55, %v1776_v0  ;;  %v1046_v12 = vmul.f32 %v1916_v30, %v965_v15  ;;  %v808_v56 = vmul.f32 %v2035_v42, %v807_v26  ;;  %1324 = vrsqrt.f32 %v2040_v28  ;;  %v579_v44 = vpop.xlane.xlu2 %578  ;;  %v593_v34 = vpop.xlane.xlu0 %592 }
 0x233   :  { %v625_v13 = vpop.xlane.xlu1 %624  ;;  %v889_v18 = vmul.f32 0.5, %v888_v39  ;;  %v881_v19 = vmul.f32 %v1315_v21, %v880_v38  ;;  %vm812_vm5 = vweird.f32 %v2008_v8  ;;  %vm893_vm7 = vweird.f32 %v2029_v5 }
 0x234   :  { %v1098_v36 = vadd.f32 %v1921_v22, %v1062_v52  ;;  %v1078_v0 = vmul.f32 %v1046_v12, %v1779_v2  ;;  %v809_v1 = vmul.f32 0.5, %v808_v56  ;;  %v2062_v53 = vadd.f32 1e-05, %v659_v59  ;;  %v2064_v25 = vpop.eup %1320  ;;  %vm894_vm10 = vmor %vm892_vm4, %vm893_vm7 }
 0x235   :  { %v890_v50 = vsub.f32 1.5, %v889_v18  ;;  %v660_v54 = vmul.f32 0.03125, %v625_v13  ;;  %v885_v24 = vsel %vm884_vm6, %v1315_v21, %v881_v19  ;;  %vm813_vm8 = vweird.f32 %v2035_v42 }
 0x236   :  { %1130 = vst [vmem:[#allocation2 + $0x50] sm:$0xff] %v1098_v36  ;;  %v1114_v2 = vadd.f32 %v1921_v22, %v1078_v0  ;;  %v810_v7 = vsub.f32 1.5, %v809_v1  ;;  %v1038_v47 = vmul.f32 %v1916_v30, %v885_v24  ;;  %v727_v43 = vmul.f32 %v2064_v25, %v2027_v10  ;;  %v2073_v61 = vpop.eup %1322  ;;  %vm814_vm11 = vmor %vm812_vm5, %vm813_vm8 }
 0x237   :  { %v891_v27 = vmul.f32 %v2029_v5, %v890_v50  ;;  %vm732_vm9 = vweird.f32 %v2027_v10  ;;  %1326 = vrsqrt.f32 %v2062_v53  ;;  %v2081_v35 = vadd.f32 1e-05, %v660_v54 }
 0x238   :  { %1146 = vst [vmem:[#allocation2 + $0xd0] sm:$0xff] %v1114_v2  ;;  %v811_v21 = vmul.f32 %v2035_v42, %v810_v7  ;;  %v637_v3 = vmul.f32 0.03125, %v579_v44  ;;  %v2083_v55 = vpop.eup %1324  ;;  %v1070_v6 = vmul.f32 %v1038_v47, %v1785_v9  ;;  %v728_v62 = vmul.f32 %v2064_v25, %v727_v43 }
 0x239   :  { %v895_v4 = vsel %vm894_vm10, %v2029_v5, %v891_v27  ;;  %v737_v14 = vmul.f32 %v2073_v61, %v2033_v20  ;;  %vm742_vm12 = vweird.f32 %v2033_v20  ;;  %v897_v9 = vmul.f32 %v2083_v55, %v2040_v28 }
 0x23a   :  { %v1039_v26 = vmul.f32 %v1916_v30, %v895_v4  ;;  %v815_v59 = vsel %vm814_vm11, %v2035_v42, %v811_v21  ;;  %v644_v5 = vmul.f32 0.03125, %v593_v34  ;;  %v1106_v52 = vadd.f32 %v1921_v22, %v1070_v6  ;;  %v597_v44 = vpop.xlane.xlu2 %596  ;;  %v611_v21 = vpop.xlane.xlu0 %610 }
 0x23b   :  { %v1031_v8 = vmul.f32 %v1916_v30, %v815_v59  ;;  %v729_v15 = vmul.f32 0.5, %v728_v62  ;;  %v738_v39 = vmul.f32 %v2073_v61, %v737_v14  ;;  %vm733_vm13 = vweird.f32 %v2064_v25  ;;  %v595_v36 = vpop.xlane.xlu1 %594 }
 0x23c   :  { %v1071_v12 = vmul.f32 %v1039_v26, %v1806_v33  ;;  %v898_v38 = vmul.f32 %v2083_v55, %v897_v9  ;;  %1328 = vrsqrt.f32 %v2081_v35  ;;  %1138 = vst [vmem:[#allocation2 + $0x90] sm:$0xff] %v1106_v52  ;;  %vm743_vm14 = vweird.f32 %v2073_v61  ;;  %vm734_vm15 = vmor %vm732_vm9, %vm733_vm13 }
 0x23d   :  { %v1063_v42 = vmul.f32 %v1031_v8, %v1797_v17  ;;  %v730_v56 = vsub.f32 1.5, %v729_v15  ;;  %v739_v13 = vmul.f32 0.5, %v738_v39  ;;  %v2108_v18 = vpop.eup %1326  ;;  %v2111_v33 = vadd.f32 1e-05, %v637_v3  ;;  %vm744_vm2 = vmor %vm742_vm12, %vm743_vm14 }
 0x23e   :  { %v1107_v0 = vadd.f32 %v1921_v22, %v1071_v12  ;;  %v899_v19 = vmul.f32 0.5, %v898_v38  ;;  %v2113_v1 = vadd.f32 1e-05, %v644_v5  ;;  %v967_v2 = vmul.f32 %v2108_v18, %v2062_v53 }
 0x23f   :  { %v1099_v50 = vadd.f32 %v1921_v22, %v1063_v42  ;;  %v731_v54 = vmul.f32 %v2064_v25, %v730_v56  ;;  %v740_v17 = vsub.f32 1.5, %v739_v13  ;;  %vm902_vm0 = vweird.f32 %v2040_v28 }
 0x240   :  { %1139 = vst [vmem:[#allocation2 + $0x98] sm:$0xff] %v1107_v0  ;;  %v900_v24 = vsub.f32 1.5, %v899_v19  ;;  %vm903_vm1 = vweird.f32 %v2083_v55  ;;  %1330 = vrsqrt.f32 %v2111_v33  ;;  %v968_v27 = vmul.f32 %v2108_v18, %v967_v2 }
 0x241   :  { %1131 = vst [vmem:[#allocation2 + $0x58] sm:$0xff] %v1099_v50  ;;  %v735_v7 = vsel %vm734_vm15, %v2064_v25, %v731_v54  ;;  %v741_v47 = vmul.f32 %v2073_v61, %v740_v17  ;;  %1332 = vrsqrt.f32 %v2113_v1  ;;  %vm972_vm3 = vweird.f32 %v2062_v53  ;;  %vm904_vm4 = vmor %vm902_vm0, %vm903_vm1 }
 0x242   :  { %v2130_v43 = vpop.eup %1328  ;;  %v1023_v10 = vmul.f32 %v1916_v30, %v735_v7  ;;  %v901_v34 = vmul.f32 %v2083_v55, %v900_v24  ;;  %v645_v25 = vmul.f32 0.03125, %v595_v36  ;;  %v969_v6 = vmul.f32 0.5, %v968_v27  ;;  %v581_v27 = vpop.xlane.xlu0 %580 }
 0x243   :  { %v745_v3 = vsel %vm744_vm2, %v2073_v61, %v741_v47  ;;  %v977_v4 = vmul.f32 %v2130_v43, %v2081_v35  ;;  %vm982_vm5 = vweird.f32 %v2081_v35  ;;  %vm973_vm6 = vweird.f32 %v2108_v18  ;;  %v613_v38 = vpop.xlane.xlu1 %612 }
 0x244   :  { %v1055_v20 = vmul.f32 %v1023_v10, %v1794_v16  ;;  %v1024_v62 = vmul.f32 %v1916_v30, %v745_v3  ;;  %v905_v14 = vsel %vm904_vm4, %v2083_v55, %v901_v34  ;;  %v2150_v26 = vadd.f32 1e-05, %v645_v25  ;;  %vm974_vm7 = vmor %vm972_vm3, %vm973_vm6 }
 0x245   :  { %v1040_v61 = vmul.f32 %v1916_v30, %v905_v14  ;;  %v970_v59 = vsub.f32 1.5, %v969_v6  ;;  %v978_v28 = vmul.f32 %v2130_v43, %v977_v4  ;;  %v646_v16 = vmul.f32 0.03125, %v597_v44 }
 0x246   :  { %v2155_v9 = vpop.eup %1330  ;;  %v1091_v5 = vadd.f32 %v1921_v22, %v1055_v20  ;;  %v1056_v52 = vmul.f32 %v1024_v62, %v1824_v37  ;;  %1334 = vrsqrt.f32 %v2150_v26  ;;  %vm983_vm8 = vweird.f32 %v2130_v43  ;;  %v615_v37 = vpop.xlane.xlu2 %614 }
 0x247   :  { %v2160_v8 = vpop.eup %1332  ;;  %v1072_v55 = vmul.f32 %v1040_v61, %v1815_v58  ;;  %v971_v15 = vmul.f32 %v2108_v18, %v970_v59  ;;  %v979_v39 = vmul.f32 0.5, %v978_v28  ;;  %v747_v12 = vmul.f32 %v2155_v9, %v2111_v33  ;;  %vm984_vm10 = vmor %vm982_vm5, %vm983_vm8 }
 0x248   :  { %1123 = vst [vmem:[#allocation2 + $0x18] sm:$0xff] %v1091_v5  ;;  %v1092_v42 = vadd.f32 %v1921_v22, %v1056_v52  ;;  %vm752_vm9 = vweird.f32 %v2111_v33  ;;  %v817_v58 = vmul.f32 %v2160_v8, %v2113_v1  ;;  %v2180_v44 = vadd.f32 1e-05, %v646_v16 }
 0x249   :  { %v1108_v56 = vadd.f32 %v1921_v22, %v1072_v55  ;;  %v975_v13 = vsel %vm974_vm7, %v2108_v18, %v971_v15  ;;  %v980_v36 = vsub.f32 1.5, %v979_v39  ;;  %v748_v0 = vmul.f32 %v2155_v9, %v747_v12 }
 0x24a   :  { %1124 = vst [vmem:[#allocation2 + $0x20] sm:$0xff] %v1092_v42  ;;  %v1047_v19 = vmul.f32 %v1916_v30, %v975_v13  ;;  %v818_v53 = vmul.f32 %v2160_v8, %v817_v58  ;;  %v653_v50 = vmul.f32 0.03125, %v611_v21  ;;  %v654_v2 = vmul.f32 0.03125, %v613_v38  ;;  %v599_v13 = vpop.xlane.xlu0 %598 }
 0x24b   :  { %1140 = vst [vmem:[#allocation2 + $0xa0] sm:$0xff] %v1108_v56  ;;  %v981_v54 = vmul.f32 %v2130_v43, %v980_v36  ;;  %v749_v17 = vmul.f32 0.5, %v748_v0  ;;  %v655_v24 = vmul.f32 0.03125, %v615_v37  ;;  %vm753_vm11 = vweird.f32 %v2155_v9 }
 0x24c   :  { %v2183_v7 = vpop.eup %1334  ;;  %v1079_v18 = vmul.f32 %v1047_v19, %v1812_v57  ;;  %v819_v47 = vmul.f32 0.5, %v818_v53  ;;  %1336 = vrsqrt.f32 %v2180_v44  ;;  %vm823_vm12 = vweird.f32 %v2160_v8  ;;  %vm754_vm13 = vmor %vm752_vm9, %vm753_vm11 }
 0x24d   :  { %v985_v10 = vsel %vm984_vm10, %v2130_v43, %v981_v54  ;;  %v750_v34 = vsub.f32 1.5, %v749_v17  ;;  %v827_v25 = vmul.f32 %v2183_v7, %v2150_v26  ;;  %v2198_v3 = vadd.f32 1e-05, %v653_v50 }
 0x24e   :  { %v1115_v57 = vadd.f32 %v1921_v22, %v1079_v18  ;;  %v1048_v21 = vmul.f32 %v1916_v30, %v985_v10  ;;  %v820_v35 = vsub.f32 1.5, %v819_v47  ;;  %v2202_v20 = vadd.f32 1e-05, %v654_v2  ;;  %v627_v42 = vpop.xlane.xlu2 %626 }
 0x24f   :  { %v751_v6 = vmul.f32 %v2155_v9, %v750_v34  ;;  %v828_v4 = vmul.f32 %v2183_v7, %v827_v25  ;;  %v2204_v43 = vadd.f32 1e-05, %v655_v24  ;;  %vm822_vm14 = vweird.f32 %v2113_v1 }
 0x250   :  { %1147 = vst [vmem:[#allocation2 + $0xd8] sm:$0xff] %v1115_v57  ;;  %v1080_v62 = vmul.f32 %v1048_v21, %v1842_v40  ;;  %v821_v14 = vmul.f32 %v2160_v8, %v820_v35  ;;  %1338 = vrsqrt.f32 %v2198_v3  ;;  %vm824_vm15 = vmor %vm822_vm14, %vm823_vm12  ;;  %v583_v40 = vpop.xlane.xlu1 %582  ;;  %vm833_vm0 = vweird.f32 %v2183_v7 }
 0x251   :  { %v755_v61 = vsel %vm754_vm13, %v2155_v9, %v751_v6  ;;  %v829_v59 = vmul.f32 0.5, %v828_v4  ;;  %1340 = vrsqrt.f32 %v2202_v20  ;;  %v638_v15 = vmul.f32 0.03125, %v581_v27 }
 0x252   :  { %v1337_v28 = vpop.eup %1336  ;;  %v1116_v5 = vadd.f32 %v1921_v22, %v1080_v62  ;;  %v1025_v33 = vmul.f32 %v1916_v30, %v755_v61  ;;  %v825_v52 = vsel %vm824_vm15, %v2160_v8, %v821_v14  ;;  %1342 = vrsqrt.f32 %v2204_v43 }
 0x253   :  { %v1032_v1 = vmul.f32 %v1916_v30, %v825_v52  ;;  %v830_v16 = vsub.f32 1.5, %v829_v59  ;;  %v837_v9 = vmul.f32 %v1337_v28, %v2180_v44  ;;  %v639_v39 = vmul.f32 0.03125, %v583_v40 }
 0x254   :  { %1148 = vst [vmem:[#allocation2 + $0xe0] sm:$0xff] %v1116_v5  ;;  %v1057_v55 = vmul.f32 %v1025_v33, %v1833_v29  ;;  %vm832_vm1 = vweird.f32 %v2150_v26  ;;  %vm842_vm3 = vweird.f32 %v2180_v44  ;;  %v2233_v56 = vadd.f32 1e-05, %v638_v15 }
 0x255   :  { %v1064_v12 = vmul.f32 %v1032_v1, %v1830_v11  ;;  %v831_v38 = vmul.f32 %v2183_v7, %v830_v16  ;;  %v838_v8 = vmul.f32 %v1337_v28, %v837_v9  ;;  %vm834_vm2 = vmor %vm832_vm1, %vm833_vm0  ;;  %v2235_v29 = vadd.f32 1e-05, %v639_v39  ;;  %v629_v1 = vpop.xlane.xlu0 %628 }
 0x256   :  { %v2229_v58 = vpop.eup %1338  ;;  %v1093_v37 = vadd.f32 %v1921_v22, %v1057_v55  ;;  %vm843_vm4 = vweird.f32 %v1337_v28  ;;  %v661_v17 = vmul.f32 0.03125, %v627_v42  ;;  %v647_v18 = vmul.f32 0.03125, %v599_v13 }
 0x257   :  { %v1341_v36 = vpop.eup %1340  ;;  %v1100_v11 = vadd.f32 %v1921_v22, %v1064_v12  ;;  %v835_v0 = vsel %vm834_vm2, %v2183_v7, %v831_v38  ;;  %v839_v26 = vmul.f32 0.5, %v838_v8  ;;  %v907_v19 = vmul.f32 %v2229_v58, %v2198_v3  ;;  %vm844_vm6 = vmor %vm842_vm3, %vm843_vm4 }
 0x258   :  { %v2241_v53 = vpop.eup %1342  ;;  %1125 = vst [vmem:[#allocation2 + $0x28] sm:$0xff] %v1093_v37  ;;  %v1033_v50 = vmul.f32 %v1916_v30, %v835_v0  ;;  %v917_v54 = vmul.f32 %v1341_v36, %v2202_v20  ;;  %vm912_vm5 = vweird.f32 %v2198_v3  ;;  %1344 = vrsqrt.f32 %v2233_v56  ;;  %v631_v14 = vpop.xlane.xlu1 %630 }
 0x259   :  { %1132 = vst [vmem:[#allocation2 + $0x60] sm:$0xff] %v1100_v11  ;;  %v840_v2 = vsub.f32 1.5, %v839_v26  ;;  %v908_v24 = vmul.f32 %v2229_v58, %v907_v19  ;;  %v927_v7 = vmul.f32 %v2241_v53, %v2204_v43  ;;  %1346 = vrsqrt.f32 %v2235_v29 }
 0x25a   :  { %v1065_v47 = vmul.f32 %v1033_v50, %v1857_v41  ;;  %v918_v27 = vmul.f32 %v1341_v36, %v917_v54  ;;  %vm913_vm7 = vweird.f32 %v2229_v58  ;;  %v2258_v21 = vadd.f32 1e-05, %v661_v17 }
 0x25b   :  { %v841_v10 = vmul.f32 %v1337_v28, %v840_v2  ;;  %v909_v34 = vmul.f32 0.5, %v908_v24  ;;  %v928_v25 = vmul.f32 %v2241_v53, %v927_v7  ;;  %v2260_v62 = vadd.f32 1e-05, %v647_v18  ;;  %vm914_vm10 = vmor %vm912_vm5, %vm913_vm7 }
 0x25c   :  { %v1101_v57 = vadd.f32 %v1921_v22, %v1065_v47  ;;  %v919_v41 = vmul.f32 0.5, %v918_v27  ;;  %vm923_vm8 = vweird.f32 %v1341_v36  ;;  %1348 = vrsqrt.f32 %v2258_v21 }
 0x25d   :  { %v845_v35 = vsel %vm844_vm6, %v1337_v28, %v841_v10  ;;  %v910_v6 = vsub.f32 1.5, %v909_v34  ;;  %v929_v4 = vmul.f32 0.5, %v928_v25  ;;  %vm933_vm9 = vweird.f32 %v2241_v53 }
 0x25e   :  { %1133 = vst [vmem:[#allocation2 + $0x68] sm:$0xff] %v1101_v57  ;;  %v1034_v61 = vmul.f32 %v1916_v30, %v845_v35  ;;  %v920_v59 = vsub.f32 1.5, %v919_v41  ;;  %1350 = vrsqrt.f32 %v2260_v62  ;;  %v1345_v28 = vpop.eup %1344  ;;  %vm922_vm11 = vweird.f32 %v2202_v20 }
 0x25f   :  { %v911_v44 = vmul.f32 %v2229_v58, %v910_v6  ;;  %v930_v40 = vsub.f32 1.5, %v929_v4  ;;  %v663_v52 = vmul.f32 0.03125, %v631_v14  ;;  %v1347_v16 = vpop.eup %1346  ;;  %vm924_vm12 = vmor %vm922_vm11, %vm923_vm8  ;;  %vm932_vm13 = vweird.f32 %v2204_v43 }
 0x260   :  { %v1066_v5 = vmul.f32 %v1034_v61, %v1851_v60  ;;  %v921_v33 = vmul.f32 %v1341_v36, %v920_v59  ;;  %v757_v60 = vmul.f32 %v1345_v28, %v2233_v56  ;;  %vm934_vm14 = vmor %vm932_vm13, %vm933_vm9  ;;  %v767_v20 = vmul.f32 %v1347_v16, %v2235_v29 }
 0x261   :  { %v915_v9 = vsel %vm914_vm10, %v2229_v58, %v911_v44  ;;  %v931_v55 = vmul.f32 %v2241_v53, %v930_v40  ;;  %v662_v42 = vmul.f32 0.03125, %v629_v1  ;;  %v2287_v11 = vadd.f32 1e-05, %v663_v52 }
 0x262   :  { %v1102_v15 = vadd.f32 %v1921_v22, %v1066_v5  ;;  %v1041_v3 = vmul.f32 %v1916_v30, %v915_v9  ;;  %v925_v39 = vsel %vm924_vm12, %v1341_v36, %v921_v33  ;;  %v758_v8 = vmul.f32 %v1345_v28, %v757_v60  ;;  %v1349_v58 = vpop.eup %1348 }
 0x263   :  { %v1042_v12 = vmul.f32 %v1916_v30, %v925_v39  ;;  %v935_v38 = vsel %vm934_vm14, %v2241_v53, %v931_v55  ;;  %v768_v13 = vmul.f32 %v1347_v16, %v767_v20  ;;  %vm763_vm15 = vweird.f32 %v1345_v28 }
 0x264   :  { %1134 = vst [vmem:[#allocation2 + $0x70] sm:$0xff] %v1102_v15  ;;  %v1073_v43 = vmul.f32 %v1041_v3, %v1848_v23  ;;  %v1043_v37 = vmul.f32 %v1916_v30, %v935_v38  ;;  %v1351_v36 = vpop.eup %1350  ;;  %v759_v26 = vmul.f32 0.5, %v758_v8  ;;  %v987_v19 = vmul.f32 %v1349_v58, %v2258_v21 }
 0x265   :  { %v1074_v0 = vmul.f32 %v1042_v12, %v1875_v45  ;;  %v769_v54 = vmul.f32 0.5, %v768_v13  ;;  %v847_v17 = vmul.f32 %v1351_v36, %v2260_v62  ;;  %vm773_vm0 = vweird.f32 %v1347_v16 }
 0x266   :  { %v1109_v53 = vadd.f32 %v1921_v22, %v1073_v43  ;;  %v1075_v50 = vmul.f32 %v1043_v37, %v1869_v31  ;;  %v760_v2 = vsub.f32 1.5, %v759_v26  ;;  %v988_v24 = vmul.f32 %v1349_v58, %v987_v19 }
 0x267   :  { %v1110_v23 = vadd.f32 %v1921_v22, %v1074_v0  ;;  %v770_v45 = vsub.f32 1.5, %v769_v54  ;;  %v848_v18 = vmul.f32 %v1351_v36, %v847_v17  ;;  %1352 = vrsqrt.f32 %v2287_v11 }
 0x268   :  { %1141 = vst [vmem:[#allocation2 + $0xa8] sm:$0xff] %v1109_v53  ;;  %v1111_v7 = vadd.f32 %v1921_v22, %v1075_v50  ;;  %v761_v47 = vmul.f32 %v1345_v28, %v760_v2  ;;  %vm762_vm1 = vweird.f32 %v2233_v56  ;;  %v989_v31 = vmul.f32 0.5, %v988_v24 }
 0x269   :  { %1142 = vst [vmem:[#allocation2 + $0xb0] sm:$0xff] %v1110_v23  ;;  %v694_v27 = vadd.f32 1e-05, %v662_v42  ;;  %vm764_vm2 = vmor %vm762_vm1, %vm763_vm15  ;;  %v771_v10 = vmul.f32 %v1347_v16, %v770_v45  ;;  %vm772_vm3 = vweird.f32 %v2235_v29  ;;  %v849_v34 = vmul.f32 0.5, %v848_v18 }
 0x26a   :  { %1143 = vst [vmem:[#allocation2 + $0xb8] sm:$0xff] %v1111_v7  ;;  %v765_v25 = vsel %vm764_vm2, %v1345_v28, %v761_v47  ;;  %vm774_vm4 = vmor %vm772_vm3, %vm773_vm0  ;;  %v990_v22 = vsub.f32 1.5, %v989_v31  ;;  %vm993_vm5 = vweird.f32 %v1349_v58  ;;  %vm853_vm6 = vweird.f32 %v1351_v36 }
 0x26b   :  { %1354 = vrsqrt.f32 %v694_v27  ;;  %v1026_v57 = vmul.f32 %v1916_v30, %v765_v25  ;;  %v775_v41 = vsel %vm774_vm4, %v1347_v16, %v771_v10  ;;  %v850_v35 = vsub.f32 1.5, %v849_v34 }
 0x26c   :  { %v1027_v56 = vmul.f32 %v1916_v30, %v775_v41  ;;  %v991_v6 = vmul.f32 %v1349_v58, %v990_v22  ;;  %vm992_vm7 = vweird.f32 %v2258_v21  ;;  %vm852_vm9 = vweird.f32 %v2260_v62  ;;  %v1356_v30 = vld [vmem:[%s2325_s3] ss:$0 sm:$0xff] }
 0x26d   :  { %v1353_v4 = vpop.eup %1352  ;;  %v1058_v29 = vmul.f32 %v1026_v57, %v1866_v46  ;;  %vm994_vm8 = vmor %vm992_vm7, %vm993_vm5  ;;  %v851_v14 = vmul.f32 %v1351_v36, %v850_v35  ;;  %v1357_v21 = vld [vmem:[%s2324_s2] ss:$0 sm:$0xff]  ;;  %vm1012_vm12 = vweird.f32 %v2287_v11  ;;  %vm1002_vm15 = vweird.f32 %v694_v27  ;;  %s1386_s2 = smov [#allocation2]  }
 0x26e   :  { %v1059_v61 = vmul.f32 %v1027_v56, %v1893_v32  ;;  %v995_v59 = vsel %vm994_vm8, %v1349_v58, %v991_v6  ;;  %vm854_vm10 = vmor %vm852_vm9, %vm853_vm6  ;;  %v1007_v44 = vmul.f32 %v1353_v4, %v2287_v11  ;;  %vm1013_vm11 = vweird.f32 %v1353_v4  ;;  %s1156_s3 = sshll.u32 %s1386_s2, 4  ;;  %s1157_s3 = int_to_ptr.vmem [resolvable:$true] %s1156_s3 }
 0x26f   :  { %v1094_v40 = vadd.f32 %v1356_v30, %v1058_v29  ;;  %v1049_v46 = vmul.f32 %v1357_v21, %v995_v59  ;;  %v855_v28 = vsel %vm854_vm10, %v1351_v36, %v851_v14  ;;  %vm1014_vm13 = vmor %vm1012_vm12, %vm1013_vm11 }
 0x270   :  { %v1095_v33 = vadd.f32 %v1356_v30, %v1059_v61  ;;  %v1035_v62 = vmul.f32 %v1357_v21, %v855_v28  ;;  %v1008_v52 = vmul.f32 %v1353_v4, %v1007_v44 }
 0x271   :  { %v1355_v5 = vpop.eup %1354  ;;  %1126 = vst [vmem:[#allocation2 + $0x30] sm:$0xff] %v1094_v40  ;;  %v1081_v32 = vmul.f32 %v1049_v46, %v1884_v48 }
 0x272   :  { %v997_v1 = vmul.f32 %v1355_v5, %v694_v27  ;;  %1127 = vst [vmem:[#allocation2 + $0x38] sm:$0xff] %v1095_v33  ;;  %v1067_v16 = vmul.f32 %v1035_v62, %v1887_v51  ;;  %v1009_v9 = vmul.f32 0.5, %v1008_v52  ;;  %vm1003_vm14 = vweird.f32 %v1355_v5 }
 0x273   :  { %v1117_v55 = vadd.f32 %v1356_v30, %v1081_v32  ;;  %vm1004_vm0 = vmor %vm1002_vm15, %vm1003_vm14 }
 0x274   :  { %v998_v60 = vmul.f32 %v1355_v5, %v997_v1  ;;  %v1103_v15 = vadd.f32 %v1356_v30, %v1067_v16  ;;  %v1010_v3 = vsub.f32 1.5, %v1009_v9 }
 0x275   :  { %1149 = vst [vmem:[#allocation2 + $0xe8] sm:$0xff] %v1117_v55 }
 0x276   :  { %v999_v39 = vmul.f32 0.5, %v998_v60  ;;  %1135 = vst [vmem:[#allocation2 + $0x78] sm:$0xff] %v1103_v15  ;;  %v1011_v20 = vmul.f32 %v1353_v4, %v1010_v3 }
 0x278   :  { %v1000_v12 = vsub.f32 1.5, %v999_v39  ;;  %v1015_v48 = vsel %vm1014_vm13, %v1353_v4, %v1011_v20 }
 0x279   :  { %v1051_v38 = vmul.f32 %v1357_v21, %v1015_v48 }
 0x27a   :  { %v1001_v8 = vmul.f32 %v1355_v5, %v1000_v12 }
 0x27b   :  { %v1083_v51 = vmul.f32 %v1051_v38, %v1908_v63 }
 0x27c   :  { %v1005_v42 = vsel %vm1004_vm0, %v1355_v5, %v1001_v8 }
 0x27d   :  { %v1050_v58 = vmul.f32 %v1357_v21, %v1005_v42  ;;  %v1119_v43 = vadd.f32 %v1356_v30, %v1083_v51 }
 0x27f   :  { %v1082_v37 = vmul.f32 %v1050_v58, %v1902_v49  ;;  %1151 = vst [vmem:[#allocation2 + $0xf8] sm:$0xff] %v1119_v43 }
 0x281   :  { %v1118_v13 = vadd.f32 %v1356_v30, %v1082_v37 }
 0x283   :  { %1150 = vst [vmem:[#allocation2 + $0xf0] sm:$0xff] %v1118_v13 }
 0x284   :  { %1164 = dma.vmem_to_hbm [thread:$0]  %s1157_s3, 4096, %s1159_s15, [#allocation3], %s1387_s16, %s1387_s16, %s1388_s17  }
 0x285   :  { %1382 = dma.done.wait [#allocation3], 4096  }
 0x286   :  { %1383 = vsyncadd [#allocation3], 4294963200 }
 0x287   :  { %1169 = vsyncpa [#allocation3], 1 }

</bundles_post_ra>
